<compile_context>
chip_gen: v5e
topology: v5e:2x2
jax: 0.10.0
libtpu: 0.0.40
codegen_flags: <defaults>
</compile_context>

<pallas_src>
import math
from functools import reduce

import jax
import jax.numpy as jnp
from jax.experimental import pallas as pl
from jax.experimental.pallas import tpu as pltpu


# ----------------------------------------------------------------------------
# Pallas kernel
# ----------------------------------------------------------------------------
def make_drqn_kernel(num_layers, num_fc, hidden_size, seq_len):
    """Builds a kernel closed over the (static) layer structure."""
    H = hidden_size
    T = seq_len

    def kernel(*refs):
        # refs = [x,
        #         (w_ih^T, w_hh^T, b) * num_layers,
        #         (w^T, b) * num_fc,
        #         out]
        x_ref = refs[0]
        idx = 1
        lstm_refs = []
        for _ in range(num_layers):
            lstm_refs.append((refs[idx], refs[idx + 1], refs[idx + 2]))
            idx += 3
        fc_refs = []
        for _ in range(num_fc):
            fc_refs.append((refs[idx], refs[idx + 1]))
            idx += 2
        out_ref = refs[idx]

        x = x_ref[...]                               # (T, D) in registers

        # -------- LSTM stack, fully unrolled, register-resident --------
        prev_hs = None                               # python list of (1, H)
        for l in range(num_layers):
            wih_ref, whh_ref, b_ref = lstm_refs[l]
            whh = whh_ref[...]                       # (H, 4H)
            b = b_ref[...]                           # (1, 4H)

            if l == 0:
                # Hoisted input projection for layer 0: one (T,D)x(D,4H)
                # matmul over all time steps, kept in registers.
                gates_in = jnp.dot(x, wih_ref[...],
                                   preferred_element_type=jnp.float32) + b
            else:
                wih = wih_ref[...]                   # (H, 4H)

            h = None
            c = None
            hs = []
            for t in range(T):
                if l == 0:
                    gin = gates_in[t:t + 1, :]       # static sublane slice
                else:
                    # Per-step input projection: depends only on the previous
                    # layer's already-computed h[t] -> off the carry chain,
                    # free to overlap (wavefront) with this layer's t-1 step.
                    gin = jnp.dot(prev_hs[t], wih,
                                  preferred_element_type=jnp.float32) + b

                if t == 0:
                    # h = c = 0 initially: skip the recurrent matmul and f*c.
                    g = gin                                       # (1, 4H)
                    sig = jax.nn.sigmoid(g)
                    i_g = sig[:, 0:H]
                    o_g = sig[:, 3 * H:4 * H]
                    g_g = jnp.tanh(g[:, 2 * H:3 * H])             # 32-lane tanh
                    c = i_g * g_g
                    h = o_g * jnp.tanh(c)
                else:
                    g = gin + jnp.dot(h, whh,
                                      preferred_element_type=jnp.float32)
                    # PyTorch gate order: i, f, g, o.
                    sig = jax.nn.sigmoid(g)                       # full-width
                    i_g = sig[:, 0:H]
                    f_g = sig[:, H:2 * H]
                    o_g = sig[:, 3 * H:4 * H]
                    g_g = jnp.tanh(g[:, 2 * H:3 * H])             # 32-lane tanh
                    c = f_g * c + i_g * g_g
                    h = o_g * jnp.tanh(c)
                hs.append(h)
            prev_hs = hs

        # -------- MLP head over the whole sequence at once --------
        z = jnp.concatenate(prev_hs, axis=0)          # (T, H), sublane pack
        for li, (w_ref, bias_ref) in enumerate(fc_refs):
            z = jnp.dot(z, w_ref[...],
                        preferred_element_type=jnp.float32) + bias_ref[...]
            if li < num_fc - 1:
                z = jnp.maximum(z, 0.0)
        out_ref[...] = z                              # single (T, A) store

    return kernel


# ----------------------------------------------------------------------------
# Wrapper
# ----------------------------------------------------------------------------
def drqn_forward(state, params):
    """state: (T, *state_shape) -> q_values: (T, 1, num_actions)."""
    T = state.shape[0]
    x = state.reshape(T, -1).astype(jnp.float32)

    lstm_params = params["lstm"]   # list of (w_ih^T (in,4H), w_hh^T (H,4H), b (1,4H))
    fc_params = params["fc"]       # list of (w^T (in,out), b (1,out))
    num_layers = len(lstm_params)
    num_fc = len(fc_params)
    H = lstm_params[0][1].shape[0]
    A = fc_params[-1][0].shape[1]

    flat_inputs = [x]
    for p in lstm_params:
        flat_inputs.extend(p)
    for p in fc_params:
        flat_inputs.extend(p)

    kernel = make_drqn_kernel(num_layers, num_fc, H, T)
    out = pl.pallas_call(
        kernel,
        out_shape=jax.ShapeDtypeStruct((T, A), jnp.float32),
        # Tiny problem: keep every array fully resident in VMEM, no grid/tiling.
        in_specs=[pl.BlockSpec(memory_space=pltpu.MemorySpace.VMEM)] * len(flat_inputs),
        out_specs=pl.BlockSpec(memory_space=pltpu.MemorySpace.VMEM),
    )(*flat_inputs)
    return out.reshape(T, 1, A)


# ----------------------------------------------------------------------------
# Deterministic parameter init (matches PyTorch module shapes / default init)
# ----------------------------------------------------------------------------
def init_params(key, state_shape, num_actions, hidden, num_layers, mlp_layers):
    D = reduce(lambda a, b: a * b, state_shape)

    def uniform(k, shape, bound):
        return jax.random.uniform(k, shape, jnp.float32, -bound, bound)

    params = {"lstm": [], "fc": []}
    in_size = D
    bound = 1.0 / math.sqrt(hidden)
    for _ in range(num_layers):
        key, k1, k2, k3, k4 = jax.random.split(key, 5)
        w_ih = uniform(k1, (4 * hidden, in_size), bound)
        w_hh = uniform(k2, (4 * hidden, hidden), bound)
        b_ih = uniform(k3, (4 * hidden,), bound)
        b_hh = uniform(k4, (4 * hidden,), bound)
        params["lstm"].append((w_ih.T, w_hh.T, (b_ih + b_hh).reshape(1, -1)))
        in_size = hidden

    layer_dims = [hidden] + list(mlp_layers) + [num_actions]
    for i in range(len(layer_dims) - 1):
        key, k1, k2 = jax.random.split(key, 3)
        b = 1.0 / math.sqrt(layer_dims[i])
        w = uniform(k1, (layer_dims[i + 1], layer_dims[i]), b)
        bias = uniform(k2, (layer_dims[i + 1],), b)
        params["fc"].append((w.T, bias.reshape(1, -1)))
    return params


# ----------------------------------------------------------------------------
# Pure-JAX reference (same math as torch.nn.LSTM + Sequential(Linear, ReLU, ...))
# ----------------------------------------------------------------------------
def drqn_reference(state, params):
    T = state.shape[0]
    x = state.reshape(T, -1).astype(jnp.float32)
    H = params["lstm"][0][1].shape[0]
    num_layers = len(params["lstm"])
    hs = [jnp.zeros((1, H), jnp.float32) for _ in range(num_layers)]
    cs = [jnp.zeros((1, H), jnp.float32) for _ in range(num_layers)]
    outs = []
    for t in range(T):
        inp = x[t:t + 1]
        for l, (wih, whh, b) in enumerate(params["lstm"]):
            gates = inp @ wih + hs[l] @ whh + b
            i_g = jax.nn.sigmoid(gates[:, :H])
            f_g = jax.nn.sigmoid(gates[:, H:2 * H])
            g_g = jnp.tanh(gates[:, 2 * H:3 * H])
            o_g = jax.nn.sigmoid(gates[:, 3 * H:])
            cs[l] = f_g * cs[l] + i_g * g_g
            hs[l] = o_g * jnp.tanh(cs[l])
            inp = hs[l]
        z = inp
        for li, (w, b) in enumerate(params["fc"]):
            z = z @ w + b
            if li < len(params["fc"]) - 1:
                z = jnp.maximum(z, 0.0)
        outs.append(z)
    return jnp.stack(outs, axis=0)  # (T, 1, A)


# ----------------------------------------------------------------------------
if __name__ == "__main__":
    # Module hyper-params (small, consistent with the PyTorch __init__)
    state_shape = [4, 16]          # flattened_state_size = 64
    num_actions = 8
    recurrent_layer_size = 32
    recurrent_layers_num = 2
    mlp_layers = [64]
    T = 6                          # number of states in the forward call

    key = jax.random.PRNGKey(0)
    key, pk, sk = jax.random.split(key, 3)
    params = init_params(pk, state_shape, num_actions,
                         recurrent_layer_size, recurrent_layers_num, mlp_layers)
    state = jax.random.normal(sk, (T, *state_shape), jnp.float32)

    q = drqn_forward(state, params)
    q = jax.block_until_ready(q)

    q_ref = drqn_reference(state, params)
    assert q.shape == (T, 1, num_actions), q.shape
    assert jnp.allclose(q, q_ref, atol=1e-4, rtol=1e-4), \
        float(jnp.max(jnp.abs(q - q_ref)))

    print("KERNEL_OK")
</pallas_src>

<mosaic_0001>
module attributes {stable_mosaic.version = 11 : i64} {
  func.func @kernel(%arg0: memref<6x64xf32, #tpu.memory_space<vmem>>, %arg1: memref<64x128xf32, #tpu.memory_space<vmem>>, %arg2: memref<32x128xf32, #tpu.memory_space<vmem>>, %arg3: memref<1x128xf32, #tpu.memory_space<vmem>>, %arg4: memref<32x128xf32, #tpu.memory_space<vmem>>, %arg5: memref<32x128xf32, #tpu.memory_space<vmem>>, %arg6: memref<1x128xf32, #tpu.memory_space<vmem>>, %arg7: memref<32x64xf32, #tpu.memory_space<vmem>>, %arg8: memref<1x64xf32, #tpu.memory_space<vmem>>, %arg9: memref<64x8xf32, #tpu.memory_space<vmem>>, %arg10: memref<1x8xf32, #tpu.memory_space<vmem>>, %arg11: memref<6x8xf32, #tpu.memory_space<vmem>>) attributes {dimension_semantics = [], scalar_prefetch = 0 : i64, scratch_operands = 0 : i64, tpu.core_type = #tpu.core_type<tc>} {
    %c0 = arith.constant 0 : index
    %c0_0 = arith.constant 0 : index
    %0 = vector.load %arg0[%c0, %c0_0] : memref<6x64xf32, #tpu.memory_space<vmem>>, vector<6x64xf32>
    %c0_1 = arith.constant 0 : index
    %c0_2 = arith.constant 0 : index
    %1 = vector.load %arg2[%c0_1, %c0_2] : memref<32x128xf32, #tpu.memory_space<vmem>>, vector<32x128xf32>
    %c0_3 = arith.constant 0 : index
    %c0_4 = arith.constant 0 : index
    %2 = vector.load %arg3[%c0_3, %c0_4] : memref<1x128xf32, #tpu.memory_space<vmem>>, vector<1x128xf32>
    %c0_5 = arith.constant 0 : index
    %c0_6 = arith.constant 0 : index
    %3 = vector.load %arg1[%c0_5, %c0_6] : memref<64x128xf32, #tpu.memory_space<vmem>>, vector<64x128xf32>
    %cst = arith.constant dense<0.000000e+00> : vector<6x128xf32>
    %4 = tpu.matmul %0, %3, %cst {dimension_numbers = #tpu.dot_dimension_numbers<[1], [0], [0], [1], [0, 0, 1, 1], [], []>} : vector<6x64xf32>, vector<64x128xf32>, vector<6x128xf32> -> vector<6x128xf32>
    %5 = vector.broadcast %2 : vector<1x128xf32> to vector<6x128xf32>
    %6 = arith.addf %4, %5 : vector<6x128xf32>
    %7 = vector.extract_strided_slice %6 {offsets = [0, 0], sizes = [1, 128], strides = [1, 1]} : vector<6x128xf32> to vector<1x128xf32>
    %8 = arith.negf %7 : vector<1x128xf32>
    %9 = math.exp %8 : vector<1x128xf32>
    %cst_7 = arith.constant 1.000000e+00 : f32
    %10 = vector.broadcast %cst_7 : f32 to vector<1x128xf32>
    %11 = arith.addf %10, %9 : vector<1x128xf32>
    %12 = arith.divf %10, %11 : vector<1x128xf32>
    %13 = vector.extract_strided_slice %12 {offsets = [0, 0], sizes = [1, 32], strides = [1, 1]} : vector<1x128xf32> to vector<1x32xf32>
    %14 = vector.extract_strided_slice %12 {offsets = [0, 96], sizes = [1, 32], strides = [1, 1]} : vector<1x128xf32> to vector<1x32xf32>
    %15 = vector.extract_strided_slice %7 {offsets = [0, 64], sizes = [1, 32], strides = [1, 1]} : vector<1x128xf32> to vector<1x32xf32>
    %16 = math.tanh %15 : vector<1x32xf32>
    %17 = arith.mulf %13, %16 : vector<1x32xf32>
    %18 = math.tanh %17 : vector<1x32xf32>
    %19 = arith.mulf %14, %18 : vector<1x32xf32>
    %20 = vector.extract_strided_slice %6 {offsets = [1, 0], sizes = [1, 128], strides = [1, 1]} : vector<6x128xf32> to vector<1x128xf32>
    %cst_8 = arith.constant dense<0.000000e+00> : vector<1x128xf32>
    %21 = tpu.matmul %19, %1, %cst_8 {dimension_numbers = #tpu.dot_dimension_numbers<[1], [0], [0], [1], [0, 0, 1, 1], [], []>} : vector<1x32xf32>, vector<32x128xf32>, vector<1x128xf32> -> vector<1x128xf32>
    %22 = arith.addf %20, %21 : vector<1x128xf32>
    %23 = arith.negf %22 : vector<1x128xf32>
    %24 = math.exp %23 : vector<1x128xf32>
    %cst_9 = arith.constant 1.000000e+00 : f32
    %25 = vector.broadcast %cst_9 : f32 to vector<1x128xf32>
    %26 = arith.addf %25, %24 : vector<1x128xf32>
    %27 = arith.divf %25, %26 : vector<1x128xf32>
    %28 = vector.extract_strided_slice %27 {offsets = [0, 0], sizes = [1, 32], strides = [1, 1]} : vector<1x128xf32> to vector<1x32xf32>
    %29 = vector.extract_strided_slice %27 {offsets = [0, 32], sizes = [1, 32], strides = [1, 1]} : vector<1x128xf32> to vector<1x32xf32>
    %30 = vector.extract_strided_slice %27 {offsets = [0, 96], sizes = [1, 32], strides = [1, 1]} : vector<1x128xf32> to vector<1x32xf32>
    %31 = vector.extract_strided_slice %22 {offsets = [0, 64], sizes = [1, 32], strides = [1, 1]} : vector<1x128xf32> to vector<1x32xf32>
    %32 = math.tanh %31 : vector<1x32xf32>
    %33 = arith.mulf %29, %17 : vector<1x32xf32>
    %34 = arith.mulf %28, %32 : vector<1x32xf32>
    %35 = arith.addf %33, %34 : vector<1x32xf32>
    %36 = math.tanh %35 : vector<1x32xf32>
    %37 = arith.mulf %30, %36 : vector<1x32xf32>
    %38 = vector.extract_strided_slice %6 {offsets = [2, 0], sizes = [1, 128], strides = [1, 1]} : vector<6x128xf32> to vector<1x128xf32>
    %cst_10 = arith.constant dense<0.000000e+00> : vector<1x128xf32>
    %39 = tpu.matmul %37, %1, %cst_10 {dimension_numbers = #tpu.dot_dimension_numbers<[1], [0], [0], [1], [0, 0, 1, 1], [], []>} : vector<1x32xf32>, vector<32x128xf32>, vector<1x128xf32> -> vector<1x128xf32>
    %40 = arith.addf %38, %39 : vector<1x128xf32>
    %41 = arith.negf %40 : vector<1x128xf32>
    %42 = math.exp %41 : vector<1x128xf32>
    %cst_11 = arith.constant 1.000000e+00 : f32
    %43 = vector.broadcast %cst_11 : f32 to vector<1x128xf32>
    %44 = arith.addf %43, %42 : vector<1x128xf32>
    %45 = arith.divf %43, %44 : vector<1x128xf32>
    %46 = vector.extract_strided_slice %45 {offsets = [0, 0], sizes = [1, 32], strides = [1, 1]} : vector<1x128xf32> to vector<1x32xf32>
    %47 = vector.extract_strided_slice %45 {offsets = [0, 32], sizes = [1, 32], strides = [1, 1]} : vector<1x128xf32> to vector<1x32xf32>
    %48 = vector.extract_strided_slice %45 {offsets = [0, 96], sizes = [1, 32], strides = [1, 1]} : vector<1x128xf32> to vector<1x32xf32>
    %49 = vector.extract_strided_slice %40 {offsets = [0, 64], sizes = [1, 32], strides = [1, 1]} : vector<1x128xf32> to vector<1x32xf32>
    %50 = math.tanh %49 : vector<1x32xf32>
    %51 = arith.mulf %47, %35 : vector<1x32xf32>
    %52 = arith.mulf %46, %50 : vector<1x32xf32>
    %53 = arith.addf %51, %52 : vector<1x32xf32>
    %54 = math.tanh %53 : vector<1x32xf32>
    %55 = arith.mulf %48, %54 : vector<1x32xf32>
    %56 = vector.extract_strided_slice %6 {offsets = [3, 0], sizes = [1, 128], strides = [1, 1]} : vector<6x128xf32> to vector<1x128xf32>
    %cst_12 = arith.constant dense<0.000000e+00> : vector<1x128xf32>
    %57 = tpu.matmul %55, %1, %cst_12 {dimension_numbers = #tpu.dot_dimension_numbers<[1], [0], [0], [1], [0, 0, 1, 1], [], []>} : vector<1x32xf32>, vector<32x128xf32>, vector<1x128xf32> -> vector<1x128xf32>
    %58 = arith.addf %56, %57 : vector<1x128xf32>
    %59 = arith.negf %58 : vector<1x128xf32>
    %60 = math.exp %59 : vector<1x128xf32>
    %cst_13 = arith.constant 1.000000e+00 : f32
    %61 = vector.broadcast %cst_13 : f32 to vector<1x128xf32>
    %62 = arith.addf %61, %60 : vector<1x128xf32>
    %63 = arith.divf %61, %62 : vector<1x128xf32>
    %64 = vector.extract_strided_slice %63 {offsets = [0, 0], sizes = [1, 32], strides = [1, 1]} : vector<1x128xf32> to vector<1x32xf32>
    %65 = vector.extract_strided_slice %63 {offsets = [0, 32], sizes = [1, 32], strides = [1, 1]} : vector<1x128xf32> to vector<1x32xf32>
    %66 = vector.extract_strided_slice %63 {offsets = [0, 96], sizes = [1, 32], strides = [1, 1]} : vector<1x128xf32> to vector<1x32xf32>
    %67 = vector.extract_strided_slice %58 {offsets = [0, 64], sizes = [1, 32], strides = [1, 1]} : vector<1x128xf32> to vector<1x32xf32>
    %68 = math.tanh %67 : vector<1x32xf32>
    %69 = arith.mulf %65, %53 : vector<1x32xf32>
    %70 = arith.mulf %64, %68 : vector<1x32xf32>
    %71 = arith.addf %69, %70 : vector<1x32xf32>
    %72 = math.tanh %71 : vector<1x32xf32>
    %73 = arith.mulf %66, %72 : vector<1x32xf32>
    %74 = vector.extract_strided_slice %6 {offsets = [4, 0], sizes = [1, 128], strides = [1, 1]} : vector<6x128xf32> to vector<1x128xf32>
    %cst_14 = arith.constant dense<0.000000e+00> : vector<1x128xf32>
    %75 = tpu.matmul %73, %1, %cst_14 {dimension_numbers = #tpu.dot_dimension_numbers<[1], [0], [0], [1], [0, 0, 1, 1], [], []>} : vector<1x32xf32>, vector<32x128xf32>, vector<1x128xf32> -> vector<1x128xf32>
    %76 = arith.addf %74, %75 : vector<1x128xf32>
    %77 = arith.negf %76 : vector<1x128xf32>
    %78 = math.exp %77 : vector<1x128xf32>
    %cst_15 = arith.constant 1.000000e+00 : f32
    %79 = vector.broadcast %cst_15 : f32 to vector<1x128xf32>
    %80 = arith.addf %79, %78 : vector<1x128xf32>
    %81 = arith.divf %79, %80 : vector<1x128xf32>
    %82 = vector.extract_strided_slice %81 {offsets = [0, 0], sizes = [1, 32], strides = [1, 1]} : vector<1x128xf32> to vector<1x32xf32>
    %83 = vector.extract_strided_slice %81 {offsets = [0, 32], sizes = [1, 32], strides = [1, 1]} : vector<1x128xf32> to vector<1x32xf32>
    %84 = vector.extract_strided_slice %81 {offsets = [0, 96], sizes = [1, 32], strides = [1, 1]} : vector<1x128xf32> to vector<1x32xf32>
    %85 = vector.extract_strided_slice %76 {offsets = [0, 64], sizes = [1, 32], strides = [1, 1]} : vector<1x128xf32> to vector<1x32xf32>
    %86 = math.tanh %85 : vector<1x32xf32>
    %87 = arith.mulf %83, %71 : vector<1x32xf32>
    %88 = arith.mulf %82, %86 : vector<1x32xf32>
    %89 = arith.addf %87, %88 : vector<1x32xf32>
    %90 = math.tanh %89 : vector<1x32xf32>
    %91 = arith.mulf %84, %90 : vector<1x32xf32>
    %92 = vector.extract_strided_slice %6 {offsets = [5, 0], sizes = [1, 128], strides = [1, 1]} : vector<6x128xf32> to vector<1x128xf32>
    %cst_16 = arith.constant dense<0.000000e+00> : vector<1x128xf32>
    %93 = tpu.matmul %91, %1, %cst_16 {dimension_numbers = #tpu.dot_dimension_numbers<[1], [0], [0], [1], [0, 0, 1, 1], [], []>} : vector<1x32xf32>, vector<32x128xf32>, vector<1x128xf32> -> vector<1x128xf32>
    %94 = arith.addf %92, %93 : vector<1x128xf32>
    %95 = arith.negf %94 : vector<1x128xf32>
    %96 = math.exp %95 : vector<1x128xf32>
    %cst_17 = arith.constant 1.000000e+00 : f32
    %97 = vector.broadcast %cst_17 : f32 to vector<1x128xf32>
    %98 = arith.addf %97, %96 : vector<1x128xf32>
    %99 = arith.divf %97, %98 : vector<1x128xf32>
    %100 = vector.extract_strided_slice %99 {offsets = [0, 0], sizes = [1, 32], strides = [1, 1]} : vector<1x128xf32> to vector<1x32xf32>
    %101 = vector.extract_strided_slice %99 {offsets = [0, 32], sizes = [1, 32], strides = [1, 1]} : vector<1x128xf32> to vector<1x32xf32>
    %102 = vector.extract_strided_slice %99 {offsets = [0, 96], sizes = [1, 32], strides = [1, 1]} : vector<1x128xf32> to vector<1x32xf32>
    %103 = vector.extract_strided_slice %94 {offsets = [0, 64], sizes = [1, 32], strides = [1, 1]} : vector<1x128xf32> to vector<1x32xf32>
    %104 = math.tanh %103 : vector<1x32xf32>
    %105 = arith.mulf %101, %89 : vector<1x32xf32>
    %106 = arith.mulf %100, %104 : vector<1x32xf32>
    %107 = arith.addf %105, %106 : vector<1x32xf32>
    %108 = math.tanh %107 : vector<1x32xf32>
    %109 = arith.mulf %102, %108 : vector<1x32xf32>
    %c0_18 = arith.constant 0 : index
    %c0_19 = arith.constant 0 : index
    %110 = vector.load %arg5[%c0_18, %c0_19] : memref<32x128xf32, #tpu.memory_space<vmem>>, vector<32x128xf32>
    %c0_20 = arith.constant 0 : index
    %c0_21 = arith.constant 0 : index
    %111 = vector.load %arg6[%c0_20, %c0_21] : memref<1x128xf32, #tpu.memory_space<vmem>>, vector<1x128xf32>
    %c0_22 = arith.constant 0 : index
    %c0_23 = arith.constant 0 : index
    %112 = vector.load %arg4[%c0_22, %c0_23] : memref<32x128xf32, #tpu.memory_space<vmem>>, vector<32x128xf32>
    %cst_24 = arith.constant dense<0.000000e+00> : vector<1x128xf32>
    %113 = tpu.matmul %19, %112, %cst_24 {dimension_numbers = #tpu.dot_dimension_numbers<[1], [0], [0], [1], [0, 0, 1, 1], [], []>} : vector<1x32xf32>, vector<32x128xf32>, vector<1x128xf32> -> vector<1x128xf32>
    %114 = arith.addf %113, %111 : vector<1x128xf32>
    %115 = arith.negf %114 : vector<1x128xf32>
    %116 = math.exp %115 : vector<1x128xf32>
    %cst_25 = arith.constant 1.000000e+00 : f32
    %117 = vector.broadcast %cst_25 : f32 to vector<1x128xf32>
    %118 = arith.addf %117, %116 : vector<1x128xf32>
    %119 = arith.divf %117, %118 : vector<1x128xf32>
    %120 = vector.extract_strided_slice %119 {offsets = [0, 0], sizes = [1, 32], strides = [1, 1]} : vector<1x128xf32> to vector<1x32xf32>
    %121 = vector.extract_strided_slice %119 {offsets = [0, 96], sizes = [1, 32], strides = [1, 1]} : vector<1x128xf32> to vector<1x32xf32>
    %122 = vector.extract_strided_slice %114 {offsets = [0, 64], sizes = [1, 32], strides = [1, 1]} : vector<1x128xf32> to vector<1x32xf32>
    %123 = math.tanh %122 : vector<1x32xf32>
    %124 = arith.mulf %120, %123 : vector<1x32xf32>
    %125 = math.tanh %124 : vector<1x32xf32>
    %126 = arith.mulf %121, %125 : vector<1x32xf32>
    %cst_26 = arith.constant dense<0.000000e+00> : vector<1x128xf32>
    %127 = tpu.matmul %37, %112, %cst_26 {dimension_numbers = #tpu.dot_dimension_numbers<[1], [0], [0], [1], [0, 0, 1, 1], [], []>} : vector<1x32xf32>, vector<32x128xf32>, vector<1x128xf32> -> vector<1x128xf32>
    %128 = arith.addf %127, %111 : vector<1x128xf32>
    %cst_27 = arith.constant dense<0.000000e+00> : vector<1x128xf32>
    %129 = tpu.matmul %126, %110, %cst_27 {dimension_numbers = #tpu.dot_dimension_numbers<[1], [0], [0], [1], [0, 0, 1, 1], [], []>} : vector<1x32xf32>, vector<32x128xf32>, vector<1x128xf32> -> vector<1x128xf32>
    %130 = arith.addf %128, %129 : vector<1x128xf32>
    %131 = arith.negf %130 : vector<1x128xf32>
    %132 = math.exp %131 : vector<1x128xf32>
    %cst_28 = arith.constant 1.000000e+00 : f32
    %133 = vector.broadcast %cst_28 : f32 to vector<1x128xf32>
    %134 = arith.addf %133, %132 : vector<1x128xf32>
    %135 = arith.divf %133, %134 : vector<1x128xf32>
    %136 = vector.extract_strided_slice %135 {offsets = [0, 0], sizes = [1, 32], strides = [1, 1]} : vector<1x128xf32> to vector<1x32xf32>
    %137 = vector.extract_strided_slice %135 {offsets = [0, 32], sizes = [1, 32], strides = [1, 1]} : vector<1x128xf32> to vector<1x32xf32>
    %138 = vector.extract_strided_slice %135 {offsets = [0, 96], sizes = [1, 32], strides = [1, 1]} : vector<1x128xf32> to vector<1x32xf32>
    %139 = vector.extract_strided_slice %130 {offsets = [0, 64], sizes = [1, 32], strides = [1, 1]} : vector<1x128xf32> to vector<1x32xf32>
    %140 = math.tanh %139 : vector<1x32xf32>
    %141 = arith.mulf %137, %124 : vector<1x32xf32>
    %142 = arith.mulf %136, %140 : vector<1x32xf32>
    %143 = arith.addf %141, %142 : vector<1x32xf32>
    %144 = math.tanh %143 : vector<1x32xf32>
    %145 = arith.mulf %138, %144 : vector<1x32xf32>
    %cst_29 = arith.constant dense<0.000000e+00> : vector<1x128xf32>
    %146 = tpu.matmul %55, %112, %cst_29 {dimension_numbers = #tpu.dot_dimension_numbers<[1], [0], [0], [1], [0, 0, 1, 1], [], []>} : vector<1x32xf32>, vector<32x128xf32>, vector<1x128xf32> -> vector<1x128xf32>
    %147 = arith.addf %146, %111 : vector<1x128xf32>
    %cst_30 = arith.constant dense<0.000000e+00> : vector<1x128xf32>
    %148 = tpu.matmul %145, %110, %cst_30 {dimension_numbers = #tpu.dot_dimension_numbers<[1], [0], [0], [1], [0, 0, 1, 1], [], []>} : vector<1x32xf32>, vector<32x128xf32>, vector<1x128xf32> -> vector<1x128xf32>
    %149 = arith.addf %147, %148 : vector<1x128xf32>
    %150 = arith.negf %149 : vector<1x128xf32>
    %151 = math.exp %150 : vector<1x128xf32>
    %cst_31 = arith.constant 1.000000e+00 : f32
    %152 = vector.broadcast %cst_31 : f32 to vector<1x128xf32>
    %153 = arith.addf %152, %151 : vector<1x128xf32>
    %154 = arith.divf %152, %153 : vector<1x128xf32>
    %155 = vector.extract_strided_slice %154 {offsets = [0, 0], sizes = [1, 32], strides = [1, 1]} : vector<1x128xf32> to vector<1x32xf32>
    %156 = vector.extract_strided_slice %154 {offsets = [0, 32], sizes = [1, 32], strides = [1, 1]} : vector<1x128xf32> to vector<1x32xf32>
    %157 = vector.extract_strided_slice %154 {offsets = [0, 96], sizes = [1, 32], strides = [1, 1]} : vector<1x128xf32> to vector<1x32xf32>
    %158 = vector.extract_strided_slice %149 {offsets = [0, 64], sizes = [1, 32], strides = [1, 1]} : vector<1x128xf32> to vector<1x32xf32>
    %159 = math.tanh %158 : vector<1x32xf32>
    %160 = arith.mulf %156, %143 : vector<1x32xf32>
    %161 = arith.mulf %155, %159 : vector<1x32xf32>
    %162 = arith.addf %160, %161 : vector<1x32xf32>
    %163 = math.tanh %162 : vector<1x32xf32>
    %164 = arith.mulf %157, %163 : vector<1x32xf32>
    %cst_32 = arith.constant dense<0.000000e+00> : vector<1x128xf32>
    %165 = tpu.matmul %73, %112, %cst_32 {dimension_numbers = #tpu.dot_dimension_numbers<[1], [0], [0], [1], [0, 0, 1, 1], [], []>} : vector<1x32xf32>, vector<32x128xf32>, vector<1x128xf32> -> vector<1x128xf32>
    %166 = arith.addf %165, %111 : vector<1x128xf32>
    %cst_33 = arith.constant dense<0.000000e+00> : vector<1x128xf32>
    %167 = tpu.matmul %164, %110, %cst_33 {dimension_numbers = #tpu.dot_dimension_numbers<[1], [0], [0], [1], [0, 0, 1, 1], [], []>} : vector<1x32xf32>, vector<32x128xf32>, vector<1x128xf32> -> vector<1x128xf32>
    %168 = arith.addf %166, %167 : vector<1x128xf32>
    %169 = arith.negf %168 : vector<1x128xf32>
    %170 = math.exp %169 : vector<1x128xf32>
    %cst_34 = arith.constant 1.000000e+00 : f32
    %171 = vector.broadcast %cst_34 : f32 to vector<1x128xf32>
    %172 = arith.addf %171, %170 : vector<1x128xf32>
    %173 = arith.divf %171, %172 : vector<1x128xf32>
    %174 = vector.extract_strided_slice %173 {offsets = [0, 0], sizes = [1, 32], strides = [1, 1]} : vector<1x128xf32> to vector<1x32xf32>
    %175 = vector.extract_strided_slice %173 {offsets = [0, 32], sizes = [1, 32], strides = [1, 1]} : vector<1x128xf32> to vector<1x32xf32>
    %176 = vector.extract_strided_slice %173 {offsets = [0, 96], sizes = [1, 32], strides = [1, 1]} : vector<1x128xf32> to vector<1x32xf32>
    %177 = vector.extract_strided_slice %168 {offsets = [0, 64], sizes = [1, 32], strides = [1, 1]} : vector<1x128xf32> to vector<1x32xf32>
    %178 = math.tanh %177 : vector<1x32xf32>
    %179 = arith.mulf %175, %162 : vector<1x32xf32>
    %180 = arith.mulf %174, %178 : vector<1x32xf32>
    %181 = arith.addf %179, %180 : vector<1x32xf32>
    %182 = math.tanh %181 : vector<1x32xf32>
    %183 = arith.mulf %176, %182 : vector<1x32xf32>
    %cst_35 = arith.constant dense<0.000000e+00> : vector<1x128xf32>
    %184 = tpu.matmul %91, %112, %cst_35 {dimension_numbers = #tpu.dot_dimension_numbers<[1], [0], [0], [1], [0, 0, 1, 1], [], []>} : vector<1x32xf32>, vector<32x128xf32>, vector<1x128xf32> -> vector<1x128xf32>
    %185 = arith.addf %184, %111 : vector<1x128xf32>
    %cst_36 = arith.constant dense<0.000000e+00> : vector<1x128xf32>
    %186 = tpu.matmul %183, %110, %cst_36 {dimension_numbers = #tpu.dot_dimension_numbers<[1], [0], [0], [1], [0, 0, 1, 1], [], []>} : vector<1x32xf32>, vector<32x128xf32>, vector<1x128xf32> -> vector<1x128xf32>
    %187 = arith.addf %185, %186 : vector<1x128xf32>
    %188 = arith.negf %187 : vector<1x128xf32>
    %189 = math.exp %188 : vector<1x128xf32>
    %cst_37 = arith.constant 1.000000e+00 : f32
    %190 = vector.broadcast %cst_37 : f32 to vector<1x128xf32>
    %191 = arith.addf %190, %189 : vector<1x128xf32>
    %192 = arith.divf %190, %191 : vector<1x128xf32>
    %193 = vector.extract_strided_slice %192 {offsets = [0, 0], sizes = [1, 32], strides = [1, 1]} : vector<1x128xf32> to vector<1x32xf32>
    %194 = vector.extract_strided_slice %192 {offsets = [0, 32], sizes = [1, 32], strides = [1, 1]} : vector<1x128xf32> to vector<1x32xf32>
    %195 = vector.extract_strided_slice %192 {offsets = [0, 96], sizes = [1, 32], strides = [1, 1]} : vector<1x128xf32> to vector<1x32xf32>
    %196 = vector.extract_strided_slice %187 {offsets = [0, 64], sizes = [1, 32], strides = [1, 1]} : vector<1x128xf32> to vector<1x32xf32>
    %197 = math.tanh %196 : vector<1x32xf32>
    %198 = arith.mulf %194, %181 : vector<1x32xf32>
    %199 = arith.mulf %193, %197 : vector<1x32xf32>
    %200 = arith.addf %198, %199 : vector<1x32xf32>
    %201 = math.tanh %200 : vector<1x32xf32>
    %202 = arith.mulf %195, %201 : vector<1x32xf32>
    %cst_38 = arith.constant dense<0.000000e+00> : vector<1x128xf32>
    %203 = tpu.matmul %109, %112, %cst_38 {dimension_numbers = #tpu.dot_dimension_numbers<[1], [0], [0], [1], [0, 0, 1, 1], [], []>} : vector<1x32xf32>, vector<32x128xf32>, vector<1x128xf32> -> vector<1x128xf32>
    %204 = arith.addf %203, %111 : vector<1x128xf32>
    %cst_39 = arith.constant dense<0.000000e+00> : vector<1x128xf32>
    %205 = tpu.matmul %202, %110, %cst_39 {dimension_numbers = #tpu.dot_dimension_numbers<[1], [0], [0], [1], [0, 0, 1, 1], [], []>} : vector<1x32xf32>, vector<32x128xf32>, vector<1x128xf32> -> vector<1x128xf32>
    %206 = arith.addf %204, %205 : vector<1x128xf32>
    %207 = arith.negf %206 : vector<1x128xf32>
    %208 = math.exp %207 : vector<1x128xf32>
    %cst_40 = arith.constant 1.000000e+00 : f32
    %209 = vector.broadcast %cst_40 : f32 to vector<1x128xf32>
    %210 = arith.addf %209, %208 : vector<1x128xf32>
    %211 = arith.divf %209, %210 : vector<1x128xf32>
    %212 = vector.extract_strided_slice %211 {offsets = [0, 0], sizes = [1, 32], strides = [1, 1]} : vector<1x128xf32> to vector<1x32xf32>
    %213 = vector.extract_strided_slice %211 {offsets = [0, 32], sizes = [1, 32], strides = [1, 1]} : vector<1x128xf32> to vector<1x32xf32>
    %214 = vector.extract_strided_slice %211 {offsets = [0, 96], sizes = [1, 32], strides = [1, 1]} : vector<1x128xf32> to vector<1x32xf32>
    %215 = vector.extract_strided_slice %206 {offsets = [0, 64], sizes = [1, 32], strides = [1, 1]} : vector<1x128xf32> to vector<1x32xf32>
    %216 = math.tanh %215 : vector<1x32xf32>
    %217 = arith.mulf %213, %200 : vector<1x32xf32>
    %218 = arith.mulf %212, %216 : vector<1x32xf32>
    %219 = arith.addf %217, %218 : vector<1x32xf32>
    %220 = math.tanh %219 : vector<1x32xf32>
    %221 = arith.mulf %214, %220 : vector<1x32xf32>
    %222 = tpu.concatenate %126, %145, %164, %183, %202, %221 in 0 : vector<1x32xf32>, vector<1x32xf32>, vector<1x32xf32>, vector<1x32xf32>, vector<1x32xf32>, vector<1x32xf32> -> vector<6x32xf32>
    %c0_41 = arith.constant 0 : index
    %c0_42 = arith.constant 0 : index
    %223 = vector.load %arg7[%c0_41, %c0_42] : memref<32x64xf32, #tpu.memory_space<vmem>>, vector<32x64xf32>
    %cst_43 = arith.constant dense<0.000000e+00> : vector<6x64xf32>
    %224 = tpu.matmul %222, %223, %cst_43 {dimension_numbers = #tpu.dot_dimension_numbers<[1], [0], [0], [1], [0, 0, 1, 1], [], []>} : vector<6x32xf32>, vector<32x64xf32>, vector<6x64xf32> -> vector<6x64xf32>
    %c0_44 = arith.constant 0 : index
    %c0_45 = arith.constant 0 : index
    %225 = vector.load %arg8[%c0_44, %c0_45] : memref<1x64xf32, #tpu.memory_space<vmem>>, vector<1x64xf32>
    %226 = vector.broadcast %225 : vector<1x64xf32> to vector<6x64xf32>
    %227 = arith.addf %224, %226 : vector<6x64xf32>
    %cst_46 = arith.constant 0.000000e+00 : f32
    %228 = vector.broadcast %cst_46 : f32 to vector<6x64xf32>
    %229 = arith.maximumf %227, %228 : vector<6x64xf32>
    %c0_47 = arith.constant 0 : index
    %c0_48 = arith.constant 0 : index
    %230 = vector.load %arg9[%c0_47, %c0_48] : memref<64x8xf32, #tpu.memory_space<vmem>>, vector<64x8xf32>
    %cst_49 = arith.constant dense<0.000000e+00> : vector<6x8xf32>
    %231 = tpu.matmul %229, %230, %cst_49 {dimension_numbers = #tpu.dot_dimension_numbers<[1], [0], [0], [1], [0, 0, 1, 1], [], []>} : vector<6x64xf32>, vector<64x8xf32>, vector<6x8xf32> -> vector<6x8xf32>
    %c0_50 = arith.constant 0 : index
    %c0_51 = arith.constant 0 : index
    %232 = vector.load %arg10[%c0_50, %c0_51] : memref<1x8xf32, #tpu.memory_space<vmem>>, vector<1x8xf32>
    %233 = vector.broadcast %232 : vector<1x8xf32> to vector<6x8xf32>
    %234 = arith.addf %231, %233 : vector<6x8xf32>
    %c0_52 = arith.constant 0 : index
    %c0_53 = arith.constant 0 : index
    %235 = vector.load %arg11[%c0_52, %c0_53] : memref<6x8xf32, #tpu.memory_space<vmem>>, vector<6x8xf32>
    tpu.vector_store %arg11[%c0_52, %c0_53], %234 {strides = array<i32>} : memref<6x8xf32, #tpu.memory_space<vmem>>, vector<6x8xf32>,
    return
  }
}

</mosaic_0001>

<bundles_post_ra>
// kernel: tpu_custom_call.1
= control target key start
LH: loop header
LB: loop body
LE: loop exit
PB: predicated region body
PF: predicated region fallthrough
CT: control target
= control target key end

     0   :  { %16 = vsyncpa [#allocation3], 0  ;;  %s1820_s0 = inlined_call_operand.vmem [shape: f32[6,64], index: 0, kind: input, shape index: {}]   ;;  %s1821_s1 = inlined_call_operand.vmem [shape: f32[64,128], index: 1, kind: input, shape index: {}]   ;;  %s1822_s2 = inlined_call_operand.hbm [shape: f32[32,128], index: 2, kind: input, shape index: {}]   ;;  %s1823_s3 = inlined_call_operand.hbm [shape: f32[1,128], index: 3, kind: input, shape index: {}]   ;;  %s1824_s4 = inlined_call_operand.hbm [shape: f32[32,128], index: 4, kind: input, shape index: {}]   ;;  %s1825_s5 = inlined_call_operand.hbm [shape: f32[32,128], index: 5, kind: input, shape index: {}]   ;;  %s1826_s6 = inlined_call_operand.hbm [shape: f32[1,128], index: 6, kind: input, shape index: {}]   ;;  %s1827_s7 = inlined_call_operand.hbm [shape: f32[32,64], index: 7, kind: input, shape index: {}]   ;;  %s1828_s8 = inlined_call_operand.hbm [shape: f32[1,64], index: 8, kind: input, shape index: {}]   ;;  %s1829_s9 = inlined_call_operand.vmem [shape: f32[64,8], index: 9, kind: input, shape index: {}]   ;;  %s1830_s10 = inlined_call_operand.vmem [shape: f32[1,8], index: 10, kind: input, shape index: {}]   ;;  %s1831_s11 = inlined_call_operand.hbm [shape: f32[6,8], index: 11, kind: output, shape index: {}]  }
   0x1   :  { %17 = vsyncpa [#allocation6], 0 }
   0x2   :  { %18 = vsyncpa [#allocation9], 0 }
   0x3   :  { %19 = vsyncpa [#allocation12], 0  ;;  %s43_s19 = sshll.u32 %s1823_s3, 4  ;;  %s44_s19 = int_to_ptr.hbm [resolvable:$true] %s43_s19 }
   0x4   :  { %20 = vsyncpa [#allocation4], 0  ;;  %s1508_s20 = smov [#allocation5]   ;;  %s66_s24 = sshll.u32 %s1825_s5, 4  ;;  %s67_s24 = int_to_ptr.hbm [resolvable:$true] %s66_s24 }
   0x5   :  { %s45_s21 = sshll.u32 %s1508_s20, 4  ;;  %s1509_s25 = smov [#allocation8]   ;;  %s46_s21 = int_to_ptr.vmem [resolvable:$true] %s45_s21 }
   0x6   :  { %48 = dma.hbm_to_vmem [thread:$0]  %s44_s19, 16, %s46_s21, [#allocation6]  }
   0x7   :  { %s68_s26 = sshll.u32 %s1509_s25, 4  ;;  %s90_s29 = sshll.u32 %s1827_s7, 4  ;;  %s69_s26 = int_to_ptr.vmem [resolvable:$true] %s68_s26  ;;  %s91_s29 = int_to_ptr.hbm [resolvable:$true] %s90_s29 }
   0x8   :  { %s1510_s3 = smov 128   ;;  %s1511_s30 = smov 8  }
   0x9   :  { %74 = dma.hbm_to_vmem [thread:$0]  %s67_s24, 512, %s69_s26, [#allocation9], %s1510_s3, %s1510_s3, %s1511_s30  }
   0xa   :  { %s29_s14 = sshll.u32 %s1822_s2, 4  ;;  %s1512_s15 = smov [#allocation11]   ;;  %s30_s14 = int_to_ptr.hbm [resolvable:$true] %s29_s14 }
   0xb   :  { %s92_s16 = sshll.u32 %s1512_s15, 4  ;;  %s1513_s5 = smov [#allocation2]   ;;  %s93_s16 = int_to_ptr.vmem [resolvable:$true] %s92_s16 }
   0xc   :  { %98 = dma.hbm_to_vmem [thread:$0]  %s91_s29, 512, %s93_s16, [#allocation12], %s1510_s3, %s1510_s3, %s1511_s30  }
   0xd   :  { %s31_s17 = sshll.u32 %s1513_s5, 4  ;;  %s53_s7 = sshll.u32 %s1824_s4, 4  ;;  %s32_s17 = int_to_ptr.vmem [resolvable:$true] %s31_s17  ;;  %s54_s7 = int_to_ptr.hbm [resolvable:$true] %s53_s7 }
   0xe   :  { %37 = dma.hbm_to_vmem [thread:$0]  %s30_s14, 512, %s32_s17, [#allocation3], %s1510_s3, %s1510_s3, %s1511_s30  }
   0xf   :  { %s80_s22 = sshll.u32 %s1826_s6, 4  ;;  %s1514_s23 = smov [#allocation7]   ;;  %s81_s22 = int_to_ptr.hbm [resolvable:$true] %s80_s22 }
  0x10   :  { %s55_s2 = sshll.u32 %s1514_s23, 4  ;;  %s1515_s24 = smov [#allocation10]   ;;  %s56_s2 = int_to_ptr.vmem [resolvable:$true] %s55_s2 }
  0x11   :  { %61 = dma.hbm_to_vmem [thread:$0]  %s54_s7, 512, %s56_s2, [#allocation6], %s1510_s3, %s1510_s3, %s1511_s30  }
  0x12   :  { %s82_s25 = sshll.u32 %s1515_s24, 4  ;;  %s104_s28 = sshll.u32 %s1828_s8, 4  ;;  %s83_s25 = int_to_ptr.vmem [resolvable:$true] %s82_s25  ;;  %s105_s28 = int_to_ptr.hbm [resolvable:$true] %s104_s28 }
  0x13   :  { %85 = dma.hbm_to_vmem [thread:$0]  %s81_s22, 16, %s83_s25, [#allocation9]  }
  0x14   :  { %s1516_s4 = smov [#allocation13]  }
  0x15   :  { %s106_s29 = sshll.u32 %s1516_s4, 4  ;;  %s107_s29 = int_to_ptr.vmem [resolvable:$true] %s106_s29 }
  0x16   :  { %109 = dma.hbm_to_vmem [thread:$0]  %s105_s28, 16, %s107_s29, [#allocation12]  }
  0x17   :  { %1498 = dma.done.wait [#allocation3], 512  }
  0x18   :  { %1499 = vsyncadd [#allocation3], 4294966784 }
  0x19   :  { %1500 = dma.done.wait [#allocation6], 528  }
  0x1a   :  { %1501 = vsyncadd [#allocation6], 4294966768 }
  0x1b   :  { %1502 = dma.done.wait [#allocation9], 528  }
  0x1c   :  { %1503 = vsyncadd [#allocation9], 4294966768 }
  0x1d   :  { %1504 = dma.done.wait [#allocation12], 528  }
  0x1e   :  { %1505 = vsyncadd [#allocation12], 4294966768  ;;  %v155_v0 = vld [vmem:[%s1821_s1 + $0x38] sm:$0xff]  ;;  %v154_v1 = vld [vmem:[%s1821_s1 + $0x30] sm:$0xff]  ;;  %vm159_vm0 = vcmask 523264   ;;  %s1517_s2 = smov 64  }
  0x1f   :  { %171 = vmatpush.msra.mxu0 %v155_v0  ;;  %v153_v2 = vld [vmem:[%s1821_s1 + $0x28] sm:$0xff]  ;;  %v152_v3 = vld [vmem:[%s1821_s1 + $0x20] sm:$0xff]  ;;  %v151_v4 = vld [vmem:[%s1821_s1 + $0x18] sm:$0xff]  ;;  %vm217_vm5 = vcmask 261120   ;;  %s1520_s18 = smov [#allocation14]   ;;  %s1150_s21 = sshll.u32 %s1831_s11, 4  ;;  %s1151_s21 = int_to_ptr.hbm [resolvable:$true] %s1150_s21 }
  0x20   :  { %v150_v5 = vld [vmem:[%s1821_s1 + $0x10] sm:$0xff]  ;;  %v149_v6 = vld [vmem:[%s1821_s1 + $0x8] sm:$0xff]  ;;  %v148_v7 = vld [vmem:[%s1821_s1] sm:$0xff]  ;;  %s1519_s1 = smov 96   ;;  %s1148_s19 = sshll.u32 %s1520_s18, 4  ;;  %s1149_s19 = int_to_ptr.vmem [resolvable:$true] %s1148_s19 }
  0x21   :  { %172 = vmatpush.msra.mxu0 %v154_v1  ;;  %v142_v8 = vld [vmem:[%s1820_s0] sm:$0x3f]  ;;  %s1518_s0 = smov 32   ;;  %v146_v30 = vld [vmem:[#allocation2 + $0x18] sm:$0xff]  ;;  %v145_v31 = vld [vmem:[#allocation2 + $0x10] sm:$0xff] }
  0x22   :  { %v1207_v9 = vld [vmem:[#allocation5] ss:$0 sm:$0xff]  ;;  %232 = vmatpush.msra.mxu1 %v146_v30  ;;  %304 = vmatpush.msra.mxu2 %v146_v30  ;;  %v144_v32 = vld [vmem:[#allocation2 + $0x8] sm:$0xff]  ;;  %v1651_v62 = vld [vmem:[#allocation7 + $0x10] sm:$0xff] }
  0x23   :  { %173 = vmatpush.msra.mxu0 %v153_v2  ;;  %374 = vmatpush.msra.mxu3 %v146_v30  ;;  %v143_v33 = vld [vmem:[#allocation2] sm:$0xff]  ;;  %v1655_v63 = vld [vmem:[#allocation7 + $0x8] sm:$0xff] }
  0x24   :  { %233 = vmatpush.msra.mxu1 %v145_v31  ;;  %305 = vmatpush.msra.mxu2 %v145_v31  ;;  %v1649_v61 = vld [vmem:[#allocation7 + $0x18] sm:$0xff]  ;;  %v1659_v0 = vld [vmem:[#allocation7] sm:$0xff] }
  0x25   :  { %174 = vmatpush.msra.mxu0 %v152_v3  ;;  %375 = vmatpush.msra.mxu3 %v145_v31 }
  0x26   :  { %234 = vmatpush.msra.mxu1 %v144_v32  ;;  %306 = vmatpush.msra.mxu2 %v144_v32 }
  0x27   :  { %175 = vmatpush.msra.mxu0 %v151_v4  ;;  %376 = vmatpush.msra.mxu3 %v144_v32 }
  0x28   :  { %235 = vmatpush.msra.mxu1 %v143_v33  ;;  %307 = vmatpush.msra.mxu2 %v143_v33 }
  0x29   :  { %176 = vmatpush.msra.mxu0 %v150_v5  ;;  %377 = vmatpush.msra.mxu3 %v143_v33 }
  0x2a   :  { %444 = vmatpush.msrb.mxu1 %v146_v30  ;;  %514 = vmatpush.msrb.mxu2 %v146_v30 }
  0x2b   :  { %177 = vmatpush.msra.mxu0 %v149_v6  ;;  %587 = vmatpush.msrb.mxu3 %v1649_v61 }
  0x2c   :  { %445 = vmatpush.msrb.mxu1 %v145_v31  ;;  %515 = vmatpush.msrb.mxu2 %v145_v31 }
  0x2d   :  { %178 = vmatpush.msra.mxu0 %v148_v7  ;;  %588 = vmatpush.msrb.mxu3 %v1651_v62 }
  0x2e   :  { %1163 = vmatmul.msk.f32.vlgmr.msra.gmra.mxu0 %vm159_vm0, %v142_v8  ;;  %446 = vmatpush.msrb.mxu1 %v144_v32 }
  0x2f   :  { %516 = vmatpush.msrb.mxu2 %v144_v32  ;;  %638 = vmatpush.msrb.mxu0 %v1649_v61 }
  0x30   :  { %447 = vmatpush.msrb.mxu1 %v143_v33  ;;  %589 = vmatpush.msrb.mxu3 %v1655_v63 }
  0x31   :  { %517 = vmatpush.msrb.mxu2 %v143_v33  ;;  %639 = vmatpush.msrb.mxu0 %v1651_v62 }
  0x32   :  { %590 = vmatpush.msrb.mxu3 %v1659_v0 }
  0x33   :  { %640 = vmatpush.msrb.mxu0 %v1655_v63 }
  0x35   :  { %641 = vmatpush.msrb.mxu0 %v1659_v0 }
  0x37   :  { %808 = vmatpush.msra.mxu0 %v1649_v61 }
  0x39   :  { %809 = vmatpush.msra.mxu0 %v1651_v62 }
  0x3b   :  { %810 = vmatpush.msra.mxu0 %v1655_v63 }
  0x3d   :  { %811 = vmatpush.msra.mxu0 %v1659_v0 }
  0xab   :  { %v180_v10 = vpop.f32.mrf.mxu0 }
  0xac   :  { %v1630_v11 = vadd.f32 %v1207_v9, %v180_v10 }
  0xae   :  { %1210 = vtanh.f32 %v1630_v11  ;;  %v1164_v13 = vmul.f32 -1.442695, %v1630_v11 }
  0xb0   :  { %1212 = vpow2.f32 %v1164_v13 }
  0xb4   :  { %v1211_v12 = vpop.eup %1210 }
  0xb5   :  { %204 = vrot.lane.b32.xlu0 %v1211_v12, %s1517_s2 }
  0xb6   :  { %v1213_v14 = vpop.eup %1212 }
  0xb7   :  { %v186_v15 = vadd.f32 1.0, %v1213_v14 }
  0xb9   :  { %1214 = vrcp.f32 %v186_v15  ;;  %v198_v21 = vand.u32 2147483648, %v186_v15  ;;  %vm192_vm2 = vweird.f32 %v186_v15  ;;  %v196_v22 = vand.u32 2147483647, %v186_v15 }
  0xbb   :  { %v199_v24 = vor.u32 1.1754944e-38, %v198_v21  ;;  %vm197_vm4 = vcmp.eq.f32.partialorder %v196_v22, 8.507059e+37 }
  0xbf   :  { %v1215_v16 = vpop.eup %1214 }
  0xc0   :  { %v188_v17 = vmul.f32 %v1215_v16, %v186_v15  ;;  %vm193_vm1 = vweird.f32 %v1215_v16 }
  0xc1   :  { %vm194_vm3 = vmor %vm192_vm2, %vm193_vm1 }
  0xc2   :  { %v189_v18 = vsub.f32 1.0, %v188_v17 }
  0xc4   :  { %v190_v19 = vmul.f32 %v1215_v16, %v189_v18 }
  0xc6   :  { %v191_v20 = vadd.f32 %v1215_v16, %v190_v19 }
  0xc8   :  { %v195_v23 = vsel %vm194_vm3, %v1215_v16, %v191_v20 }
  0xc9   :  { %v200_v26 = vsel %vm197_vm4, %v199_v24, %v195_v23 }
 0x127   :  { %v205_v25 = vpop.permute.xlu0 %204 }
 0x128   :  { %v207_v27 = vmul.f32 %v205_v25, %v200_v26 }
 0x12a   :  { %1216 = vtanh.f32 %v207_v27  ;;  %v265_v28 = vrot.slane %v207_v27, 7 }
 0x12c   :  { %266 = vrot.lane.b32.xlu2 %v265_v28, %s1518_s0 }
 0x130   :  { %v1217_v29 = vpop.eup %1216 }
 0x131   :  { %210 = vrot.lane.b32.xlu0 %v1217_v29, %s1519_s1 }
 0x186   :  { %v267_v56 = vpop.permute.xlu2 %266 }
 0x1a3   :  { %v211_v34 = vpop.permute.xlu0 %210 }
 0x1a4   :  { %v213_v35 = vmul.f32 %v211_v34, %v200_v26 }
 0x1a6   :  { %215 = vrot.lane.b32.xlu1 %v213_v35, %s1518_s0 }
 0x218   :  { %v1638_v36 = vpop.permute.xlu1 %215 }
 0x219   :  { %1165 = vmatmul.msk.f32.vlgmr.msra.gmra.mxu1 %vm217_vm5, %v1638_v36 }
 0x296   :  { %v237_v37 = vpop.f32.mrf.mxu1 }
 0x297   :  { %v241_v38 = vrot.slane %v237_v37, 7 }
 0x299   :  { %v243_v39 = vadd.f32 %v241_v38, %v1630_v11  ;;  %v1696_v38 = vld [vmem:[#allocation10] sm:$0x1] }
 0x29b   :  { %1218 = vtanh.f32 %v243_v39  ;;  %v1166_v41 = vmul.f32 -1.442695, %v243_v39 }
 0x29d   :  { %1220 = vpow2.f32 %v1166_v41 }
 0x2a1   :  { %v1219_v40 = vpop.eup %1218 }
 0x2a2   :  { %271 = vrot.lane.b32.xlu1 %v1219_v40, %s1517_s2 }
 0x2a3   :  { %v1221_v42 = vpop.eup %1220 }
 0x2a4   :  { %v247_v43 = vadd.f32 1.0, %v1221_v42 }
 0x2a6   :  { %1222 = vrcp.f32 %v247_v43  ;;  %v259_v49 = vand.u32 2147483648, %v247_v43  ;;  %vm253_vm7 = vweird.f32 %v247_v43  ;;  %v257_v50 = vand.u32 2147483647, %v247_v43 }
 0x2a8   :  { %v260_v52 = vor.u32 1.1754944e-38, %v259_v49  ;;  %vm258_vm9 = vcmp.eq.f32.partialorder %v257_v50, 8.507059e+37 }
 0x2ac   :  { %v1223_v44 = vpop.eup %1222 }
 0x2ad   :  { %v249_v45 = vmul.f32 %v1223_v44, %v247_v43  ;;  %vm254_vm6 = vweird.f32 %v1223_v44 }
 0x2ae   :  { %vm255_vm8 = vmor %vm253_vm7, %vm254_vm6 }
 0x2af   :  { %v250_v46 = vsub.f32 1.0, %v249_v45 }
 0x2b1   :  { %v251_v47 = vmul.f32 %v1223_v44, %v250_v46 }
 0x2b3   :  { %v252_v48 = vadd.f32 %v1223_v44, %v251_v47 }
 0x2b5   :  { %v256_v51 = vsel %vm255_vm8, %v1223_v44, %v252_v48 }
 0x2b6   :  { %v261_v54 = vsel %vm258_vm9, %v260_v52, %v256_v51 }
 0x2b7   :  { %v269_v57 = vmul.f32 %v267_v56, %v261_v54 }
 0x314   :  { %v272_v53 = vpop.permute.xlu1 %271 }
 0x315   :  { %v274_v55 = vmul.f32 %v272_v53, %v261_v54 }
 0x317   :  { %276 = vrot.lane.b32.xlu2 %v274_v55, %s1518_s0 }
 0x371   :  { %v277_v58 = vpop.permute.xlu2 %276 }
 0x372   :  { %v1645_v59 = vadd.f32 %v277_v58, %v269_v57 }
 0x374   :  { %1224 = vtanh.f32 %v1645_v59  ;;  %v337_v25 = vrot.slane %v1645_v59, 7 }
 0x37a   :  { %v1225_v60 = vpop.eup %1224 }
 0x37b   :  { %282 = vrot.lane.b32.xlu0 %v1225_v60, %s1517_s2 }
 0x3ed   :  { %v283_v1 = vpop.permute.xlu0 %282 }
 0x3ee   :  { %v285_v2 = vmul.f32 %v283_v1, %v261_v54 }
 0x3f0   :  { %v287_v3 = vrot.slane %v285_v2, 1 }
 0x3f2   :  { %288 = vrot.lane.b32.xlu1 %v287_v3, %s1518_s0 }
 0x464   :  { %v289_v4 = vpop.permute.xlu1 %288 }
 0x465   :  { %1167 = vmatmul.msk.f32.vlgmr.msra.gmra.mxu2 %vm217_vm5, %v289_v4  ;;  %1177 = vmatmul.msk.f32.vlgmr.msrb.gmra.mxu0 %vm217_vm5, %v289_v4 }
 0x466   :  { %725 = vmatpush.msra.mxu2 %v1649_v61  ;;  %980 = vmatpush.msrb.mxu0 %v1649_v61 }
 0x468   :  { %726 = vmatpush.msra.mxu2 %v1651_v62  ;;  %981 = vmatpush.msrb.mxu0 %v1651_v62 }
 0x46a   :  { %727 = vmatpush.msra.mxu2 %v1655_v63  ;;  %982 = vmatpush.msrb.mxu0 %v1655_v63 }
 0x46c   :  { %728 = vmatpush.msra.mxu2 %v1659_v0  ;;  %983 = vmatpush.msrb.mxu0 %v1659_v0 }
 0x4e8   :  { %v309_v5 = vpop.f32.mrf.mxu2 }
 0x4e9   :  { %v313_v6 = vrot.slane %v309_v5, 6 }
 0x4eb   :  { %v315_v7 = vadd.f32 %v313_v6, %v1630_v11 }
 0x4ed   :  { %1226 = vtanh.f32 %v315_v7  ;;  %v1168_v9 = vmul.f32 -1.442695, %v315_v7 }
 0x4ef   :  { %1228 = vpow2.f32 %v1168_v9 }
 0x4f3   :  { %v1227_v8 = vpop.eup %1226 }
 0x4f4   :  { %341 = vrot.lane.b32.xlu2 %v1227_v8, %s1517_s2 }
 0x4f5   :  { %v1229_v10 = vpop.eup %1228 }
 0x4f6   :  { %v319_v12 = vadd.f32 1.0, %v1229_v10 }
 0x4f8   :  { %1230 = vrcp.f32 %v319_v12  ;;  %v331_v18 = vand.u32 2147483648, %v319_v12  ;;  %vm325_vm11 = vweird.f32 %v319_v12  ;;  %v329_v19 = vand.u32 2147483647, %v319_v12 }
 0x4fa   :  { %v332_v21 = vor.u32 1.1754944e-38, %v331_v18  ;;  %vm330_vm13 = vcmp.eq.f32.partialorder %v329_v19, 8.507059e+37 }
 0x4fe   :  { %v1231_v13 = vpop.eup %1230 }
 0x4ff   :  { %v321_v14 = vmul.f32 %v1231_v13, %v319_v12  ;;  %vm326_vm10 = vweird.f32 %v1231_v13 }
 0x500   :  { %vm327_vm12 = vmor %vm325_vm11, %vm326_vm10 }
 0x501   :  { %v322_v15 = vsub.f32 1.0, %v321_v14 }
 0x503   :  { %v323_v16 = vmul.f32 %v1231_v13, %v322_v15 }
 0x505   :  { %v324_v17 = vadd.f32 %v1231_v13, %v323_v16 }
 0x507   :  { %v328_v20 = vsel %vm327_vm12, %v1231_v13, %v324_v17 }
 0x508   :  { %v333_v23 = vsel %vm330_vm13, %v332_v21, %v328_v20 }
 0x509   :  { %v339_v26 = vmul.f32 %v337_v25, %v333_v23  ;;  %v568_v25 = vld [vmem:[#allocation8 + $0x10] sm:$0xff] }
 0x54e   :  { %v342_v22 = vpop.permute.xlu2 %341 }
 0x54f   :  { %v344_v24 = vmul.f32 %v342_v22, %v333_v23 }
 0x551   :  { %346 = vrot.lane.b32.xlu0 %v344_v24, %s1518_s0  ;;  %v569_v24 = vld [vmem:[#allocation8 + $0x18] sm:$0xff] }
 0x552   :  { %663 = vmatpush.msra.mxu1 %v569_v24 }
 0x554   :  { %664 = vmatpush.msra.mxu1 %v568_v25 }
 0x5c3   :  { %v347_v27 = vpop.permute.xlu0 %346 }
 0x5c4   :  { %v1684_v28 = vadd.f32 %v347_v27, %v339_v26  ;;  %v567_v26 = vld [vmem:[#allocation8 + $0x8] sm:$0xff]  ;;  %v566_v27 = vld [vmem:[#allocation8] sm:$0xff] }
 0x5c5   :  { %665 = vmatpush.msra.mxu1 %v567_v26 }
 0x5c6   :  { %1232 = vtanh.f32 %v1684_v28  ;;  %v407_v14 = vrot.slane %v1684_v28, 7 }
 0x5c7   :  { %666 = vmatpush.msra.mxu1 %v566_v27 }
 0x5cc   :  { %v1233_v29 = vpop.eup %1232 }
 0x5cd   :  { %352 = vrot.lane.b32.xlu1 %v1233_v29, %s1517_s2 }
 0x63f   :  { %v353_v30 = vpop.permute.xlu1 %352 }
 0x640   :  { %v355_v31 = vmul.f32 %v353_v30, %v333_v23 }
 0x642   :  { %v357_v32 = vrot.slane %v355_v31, 2 }
 0x644   :  { %358 = vrot.lane.b32.xlu2 %v357_v32, %s1518_s0 }
 0x69e   :  { %v1689_v33 = vpop.permute.xlu2 %358 }
 0x69f   :  { %1169 = vmatmul.msk.f32.vlgmr.msra.gmra.mxu3 %vm217_vm5, %v1689_v33 }
 0x6a0   :  { %750 = vmatpush.msra.mxu3 %v569_v24 }
 0x6a2   :  { %751 = vmatpush.msra.mxu3 %v568_v25 }
 0x6a4   :  { %752 = vmatpush.msra.mxu3 %v567_v26 }
 0x6a6   :  { %753 = vmatpush.msra.mxu3 %v566_v27 }
 0x6a7   :  { %1175 = vmatmul.msk.f32.vlgmr.msrb.gmra.mxu3 %vm217_vm5, %v1638_v36 }
 0x6a8   :  { %916 = vmatpush.msrb.mxu3 %v569_v24 }
 0x6aa   :  { %917 = vmatpush.msrb.mxu3 %v568_v25 }
 0x6ac   :  { %918 = vmatpush.msrb.mxu3 %v567_v26 }
 0x6ae   :  { %919 = vmatpush.msrb.mxu3 %v566_v27 }
 0x722   :  { %v379_v34 = vpop.f32.mrf.mxu3 }
 0x723   :  { %v383_v35 = vrot.slane %v379_v34, 5  ;;  %v643_v34 = vpop.f32.mrf.mxu0 }
 0x725   :  { %v385_v37 = vadd.f32 %v383_v35, %v1630_v11  ;;  %v644_v35 = vadd.f32 %v643_v34, %v1696_v38 }
 0x727   :  { %1234 = vtanh.f32 %v385_v37  ;;  %v1170_v44 = vmul.f32 -1.442695, %v385_v37 }
 0x72a   :  { %v592_v39 = vpop.f32.mrf.mxu3 }
 0x72b   :  { %v593_v40 = vadd.f32 %v592_v39, %v1696_v38 }
 0x72d   :  { %v1235_v41 = vpop.eup %1234  ;;  %1236 = vtanh.f32 %v593_v40  ;;  %v1176_v43 = vmul.f32 -1.442695, %v593_v40 }
 0x72e   :  { %411 = vrot.lane.b32.xlu0 %v1235_v41, %s1517_s2 }
 0x72f   :  { %1238 = vpow2.f32 %v1176_v43 }
 0x730   :  { %1240 = vpow2.f32 %v1170_v44 }
 0x733   :  { %v1237_v42 = vpop.eup %1236 }
 0x734   :  { %616 = vrot.lane.b32.xlu2 %v1237_v42, %s1517_s2 }
 0x735   :  { %v1239_v36 = vpop.eup %1238 }
 0x736   :  { %v1241_v45 = vpop.eup %1240  ;;  %v598_v46 = vadd.f32 1.0, %v1239_v36 }
 0x737   :  { %v389_v47 = vadd.f32 1.0, %v1241_v45 }
 0x738   :  { %1242 = vrcp.f32 %v598_v46  ;;  %v610_v57 = vand.u32 2147483648, %v598_v46  ;;  %vm604_vm1 = vweird.f32 %v598_v46  ;;  %v608_v59 = vand.u32 2147483647, %v598_v46 }
 0x739   :  { %1244 = vrcp.f32 %v389_v47  ;;  %v401_v60 = vand.u32 2147483648, %v389_v47  ;;  %vm395_vm3 = vweird.f32 %v389_v47  ;;  %v399_v1 = vand.u32 2147483647, %v389_v47 }
 0x73a   :  { %v611_v4 = vor.u32 1.1754944e-38, %v610_v57  ;;  %vm609_vm6 = vcmp.eq.f32.partialorder %v608_v59, 8.507059e+37 }
 0x73b   :  { %v402_v6 = vor.u32 1.1754944e-38, %v401_v60  ;;  %vm400_vm7 = vcmp.eq.f32.partialorder %v399_v1, 8.507059e+37 }
 0x73e   :  { %v1243_v48 = vpop.eup %1242 }
 0x73f   :  { %v1245_v49 = vpop.eup %1244  ;;  %v600_v50 = vmul.f32 %v1243_v48, %v598_v46  ;;  %vm605_vm14 = vweird.f32 %v1243_v48 }
 0x740   :  { %v391_v51 = vmul.f32 %v1245_v49, %v389_v47  ;;  %vm396_vm15 = vweird.f32 %v1245_v49  ;;  %vm606_vm2 = vmor %vm604_vm1, %vm605_vm14 }
 0x741   :  { %v601_v52 = vsub.f32 1.0, %v600_v50  ;;  %vm397_vm4 = vmor %vm395_vm3, %vm396_vm15 }
 0x742   :  { %v392_v53 = vsub.f32 1.0, %v391_v51 }
 0x743   :  { %v602_v54 = vmul.f32 %v1243_v48, %v601_v52 }
 0x744   :  { %v393_v55 = vmul.f32 %v1245_v49, %v392_v53 }
 0x745   :  { %v603_v56 = vadd.f32 %v1243_v48, %v602_v54 }
 0x746   :  { %v394_v58 = vadd.f32 %v1245_v49, %v393_v55 }
 0x747   :  { %v607_v2 = vsel %vm606_vm2, %v1243_v48, %v603_v56 }
 0x748   :  { %v398_v5 = vsel %vm397_vm4, %v1245_v49, %v394_v58  ;;  %v612_v7 = vsel %vm609_vm6, %v611_v4, %v607_v2  ;;  %vm1062_vm6 = vcmask 1040384  }
 0x749   :  { %v403_v10 = vsel %vm400_vm7, %v402_v6, %v398_v5  ;;  %vm1064_vm7 = vcmask 1041408  }
 0x74a   :  { %v409_v15 = vmul.f32 %v407_v14, %v403_v10 }
 0x78e   :  { %v617_v3 = vpop.permute.xlu2 %616 }
 0x78f   :  { %v1701_v8 = vmul.f32 %v617_v3, %v612_v7 }
 0x791   :  { %1246 = vtanh.f32 %v1701_v8 }
 0x797   :  { %v1247_v13 = vpop.eup %1246 }
 0x7a0   :  { %v412_v9 = vpop.permute.xlu0 %411 }
 0x7a1   :  { %v414_v12 = vmul.f32 %v412_v9, %v403_v10 }
 0x7a3   :  { %416 = vrot.lane.b32.xlu1 %v414_v12, %s1518_s0 }
 0x7ab   :  { %622 = vrot.lane.b32.xlu1 %v1247_v13, %s1519_s1 }
 0x815   :  { %v417_v16 = vpop.permute.xlu1 %416 }
 0x816   :  { %v1707_v17 = vadd.f32 %v417_v16, %v409_v15 }
 0x818   :  { %1248 = vtanh.f32 %v1707_v17 }
 0x81d   :  { %v623_v19 = vpop.permute.xlu1 %622 }
 0x81e   :  { %v1249_v18 = vpop.eup %1248  ;;  %v1711_v20 = vmul.f32 %v623_v19, %v612_v7 }
 0x81f   :  { %422 = vrot.lane.b32.xlu0 %v1249_v18, %s1517_s2  ;;  %v477_v18 = vrot.slane %v1707_v17, 7 }
 0x827   :  { %647 = vrot.lane.b32.xlu0 %v1711_v20, %s1518_s0 }
 0x891   :  { %v423_v21 = vpop.permute.xlu0 %422 }
 0x892   :  { %v425_v22 = vmul.f32 %v423_v21, %v403_v10 }
 0x894   :  { %v427_v23 = vrot.slane %v425_v22, 3 }
 0x896   :  { %428 = vrot.lane.b32.xlu2 %v427_v23, %s1518_s0 }
 0x899   :  { %v648_v29 = vpop.permute.xlu0 %647 }
 0x8f0   :  { %v429_v28 = vpop.permute.xlu2 %428 }
 0x8f1   :  { %1171 = vmatmul.msk.f32.vlgmr.msrb.gmra.mxu1 %vm217_vm5, %v429_v28  ;;  %1183 = vmatmul.msk.f32.vlgmr.msra.gmra.mxu0 %vm217_vm5, %v429_v28 }
 0x8f2   :  { %833 = vmatpush.msrb.mxu1 %v569_v24 }
 0x8f4   :  { %834 = vmatpush.msrb.mxu1 %v568_v25 }
 0x8f6   :  { %835 = vmatpush.msrb.mxu1 %v567_v26 }
 0x8f8   :  { %836 = vmatpush.msrb.mxu1 %v566_v27 }
 0x8f9   :  { %1178 = vmatmul.msk.f32.vlgmr.msra.gmra.mxu1 %vm217_vm5, %v648_v29 }
 0x8fa   :  { %1005 = vmatpush.msra.mxu1 %v569_v24 }
 0x8fc   :  { %1006 = vmatpush.msra.mxu1 %v568_v25 }
 0x8fe   :  { %1007 = vmatpush.msra.mxu1 %v567_v26 }
 0x900   :  { %1008 = vmatpush.msra.mxu1 %v566_v27 }
 0x96e   :  { %v449_v30 = vpop.f32.mrf.mxu1 }
 0x96f   :  { %v453_v31 = vrot.slane %v449_v30, 4 }
 0x971   :  { %v455_v32 = vadd.f32 %v453_v31, %v1630_v11 }
 0x973   :  { %1250 = vtanh.f32 %v455_v32  ;;  %v1172_v36 = vmul.f32 -1.442695, %v455_v32 }
 0x976   :  { %v668_v37 = vpop.f32.mrf.mxu1 }
 0x977   :  { %v671_v39 = vadd.f32 %v668_v37, %v644_v35 }
 0x979   :  { %v1251_v40 = vpop.eup %1250  ;;  %1252 = vtanh.f32 %v671_v39  ;;  %v1179_v42 = vmul.f32 -1.442695, %v671_v39 }
 0x97a   :  { %481 = vrot.lane.b32.xlu1 %v1251_v40, %s1517_s2 }
 0x97b   :  { %1254 = vpow2.f32 %v1179_v42 }
 0x97f   :  { %v1253_v41 = vpop.eup %1252 }
 0x980   :  { %698 = vrot.lane.b32.xlu2 %v1253_v41, %s1517_s2 }
 0x981   :  { %v1255_v43 = vpop.eup %1254 }
 0x982   :  { %693 = vrot.lane.b32.xlu1 %v1701_v8, %s1518_s0  ;;  %v675_v44 = vadd.f32 1.0, %v1255_v43 }
 0x984   :  { %1256 = vrcp.f32 %v675_v44  ;;  %v687_v52 = vand.u32 2147483648, %v675_v44  ;;  %vm681_vm9 = vweird.f32 %v675_v44  ;;  %v685_v53 = vand.u32 2147483647, %v675_v44 }
 0x985   :  { %1258 = vpow2.f32 %v1172_v36 }
 0x986   :  { %v688_v56 = vor.u32 1.1754944e-38, %v687_v52  ;;  %vm686_vm11 = vcmp.eq.f32.partialorder %v685_v53, 8.507059e+37 }
 0x98a   :  { %v1257_v45 = vpop.eup %1256 }
 0x98b   :  { %v677_v46 = vmul.f32 %v1257_v45, %v675_v44  ;;  %v1259_v47 = vpop.eup %1258  ;;  %vm682_vm8 = vweird.f32 %v1257_v45 }
 0x98c   :  { %v459_v49 = vadd.f32 1.0, %v1259_v47  ;;  %vm683_vm10 = vmor %vm681_vm9, %vm682_vm8 }
 0x98d   :  { %v678_v48 = vsub.f32 1.0, %v677_v46 }
 0x98e   :  { %1260 = vrcp.f32 %v459_v49  ;;  %v471_v4 = vand.u32 2147483648, %v459_v49  ;;  %vm465_vm13 = vweird.f32 %v459_v49  ;;  %v469_v5 = vand.u32 2147483647, %v459_v49 }
 0x98f   :  { %v679_v50 = vmul.f32 %v1257_v45, %v678_v48 }
 0x990   :  { %v472_v7 = vor.u32 1.1754944e-38, %v471_v4  ;;  %vm470_vm15 = vcmp.eq.f32.partialorder %v469_v5, 8.507059e+37 }
 0x991   :  { %v680_v51 = vadd.f32 %v1257_v45, %v679_v50 }
 0x993   :  { %v684_v55 = vsel %vm683_vm10, %v1257_v45, %v680_v51 }
 0x994   :  { %v1261_v54 = vpop.eup %1260  ;;  %v689_v59 = vsel %vm686_vm11, %v688_v56, %v684_v55 }
 0x995   :  { %v461_v57 = vmul.f32 %v1261_v54, %v459_v49  ;;  %vm466_vm12 = vweird.f32 %v1261_v54 }
 0x996   :  { %vm467_vm14 = vmor %vm465_vm13, %vm466_vm12  ;;  %vm1066_vm13 = vcmask 1042432  }
 0x997   :  { %v462_v1 = vsub.f32 1.0, %v461_v57 }
 0x999   :  { %v463_v2 = vmul.f32 %v1261_v54, %v462_v1 }
 0x99b   :  { %v464_v3 = vadd.f32 %v1261_v54, %v463_v2 }
 0x99d   :  { %v468_v6 = vsel %vm467_vm14, %v1261_v54, %v464_v3 }
 0x99e   :  { %v473_v9 = vsel %vm470_vm15, %v472_v7, %v468_v6 }
 0x99f   :  { %v479_v19 = vmul.f32 %v477_v18, %v473_v9 }
 0x9da   :  { %v699_v58 = vpop.permute.xlu2 %698 }
 0x9db   :  { %v701_v60 = vmul.f32 %v699_v58, %v689_v59 }
 0x9dd   :  { %703 = vrot.lane.b32.xlu2 %v701_v60, %s1518_s0 }
 0x9ec   :  { %v482_v8 = vpop.permute.xlu1 %481 }
 0x9ed   :  { %v484_v10 = vmul.f32 %v482_v8, %v473_v9 }
 0x9ef   :  { %486 = vrot.lane.b32.xlu0 %v484_v10, %s1518_s0 }
 0x9f4   :  { %v694_v12 = vpop.permute.xlu1 %693 }
 0x9f5   :  { %v696_v13 = vmul.f32 %v694_v12, %v689_v59 }
 0xa37   :  { %v704_v14 = vpop.permute.xlu2 %703 }
 0xa38   :  { %v706_v15 = vadd.f32 %v704_v14, %v696_v13 }
 0xa3a   :  { %1262 = vtanh.f32 %v706_v15 }
 0xa40   :  { %v1263_v16 = vpop.eup %1262 }
 0xa41   :  { %709 = vrot.lane.b32.xlu1 %v1263_v16, %s1517_s2 }
 0xa61   :  { %v487_v21 = vpop.permute.xlu0 %486 }
 0xa62   :  { %v1729_v22 = vadd.f32 %v487_v21, %v479_v19 }
 0xa64   :  { %1264 = vtanh.f32 %v1729_v22 }
 0xa6a   :  { %v1265_v23 = vpop.eup %1264 }
 0xa6b   :  { %492 = vrot.lane.b32.xlu0 %v1265_v23, %s1517_s2 }
 0xab3   :  { %v710_v24 = vpop.permute.xlu1 %709 }
 0xab4   :  { %v712_v25 = vmul.f32 %v710_v24, %v689_v59  ;;  %v813_v59 = vpop.f32.mrf.mxu0 }
 0xab5   :  { %v814_v60 = vadd.f32 %v813_v59, %v1696_v38 }
 0xab6   :  { %734 = vrot.lane.b32.xlu0 %v712_v25, %s1518_s0  ;;  %v1051_v52 = vrot.slane %v712_v25, 7 }
 0xab8   :  { %v1063_v56 = vsel %vm1062_vm6, %v1711_v20, %v1051_v52 }
 0xadd   :  { %v493_v26 = vpop.permute.xlu0 %492 }
 0xade   :  { %v495_v27 = vmul.f32 %v493_v26, %v473_v9 }
 0xae0   :  { %v497_v28 = vrot.slane %v495_v27, 4 }
 0xae2   :  { %498 = vrot.lane.b32.xlu2 %v497_v28, %s1518_s0 }
 0xb28   :  { %v735_v29 = vpop.permute.xlu0 %734 }
 0xb29   :  { %1181 = vmatmul.msk.f32.vlgmr.msra.gmra.mxu3 %vm217_vm5, %v735_v29 }
 0xb3c   :  { %v499_v17 = vpop.permute.xlu2 %498 }
 0xb3d   :  { %1173 = vmatmul.msk.f32.vlgmr.msrb.gmra.mxu2 %vm217_vm5, %v499_v17 }
 0xb3e   :  { %891 = vmatpush.msrb.mxu2 %v1649_v61 }
 0xb40   :  { %892 = vmatpush.msrb.mxu2 %v1651_v62 }
 0xb42   :  { %893 = vmatpush.msrb.mxu2 %v1655_v63 }
 0xb44   :  { %894 = vmatpush.msrb.mxu2 %v1659_v0 }
 0xb45   :  { %1180 = vmatmul.msk.f32.vlgmr.msra.gmra.mxu2 %vm217_vm5, %v1689_v33 }
 0xb4d   :  { %1186 = vmatmul.msk.f32.vlgmr.msrb.gmra.mxu2 %vm217_vm5, %v499_v17 }
 0xbac   :  { %v755_v34 = vpop.f32.mrf.mxu3 }
 0xbc0   :  { %v1744_v30 = vpop.f32.mrf.mxu2 }
 0xbc1   :  { %v523_v14 = vrot.slane %v1744_v30, 3 }
 0xbc3   :  { %v525_v18 = vadd.f32 %v523_v14, %v1630_v11 }
 0xbc5   :  { %v1174_v29 = vmul.f32 -1.442695, %v525_v18 }
 0xbc8   :  { %v730_v31 = vpop.f32.mrf.mxu2 }
 0xbc9   :  { %v731_v32 = vadd.f32 %v730_v31, %v1696_v38 }
 0xbcb   :  { %v758_v35 = vadd.f32 %v755_v34, %v731_v32 }
 0xbcd   :  { %1266 = vtanh.f32 %v758_v35  ;;  %v1182_v62 = vmul.f32 -1.442695, %v758_v35 }
 0xbcf   :  { %1268 = vpow2.f32 %v1182_v62 }
 0xbd3   :  { %v1267_v61 = vpop.eup %1266 }
 0xbd4   :  { %781 = vrot.lane.b32.xlu1 %v1267_v61, %s1517_s2 }
 0xbd5   :  { %v1269_v63 = vpop.eup %1268 }
 0xbd6   :  { %v762_v0 = vadd.f32 1.0, %v1269_v63 }
 0xbd8   :  { %1270 = vrcp.f32 %v762_v0  ;;  %v774_v42 = vand.u32 2147483648, %v762_v0  ;;  %vm768_vm2 = vweird.f32 %v762_v0  ;;  %v772_v43 = vand.u32 2147483647, %v762_v0 }
 0xbda   :  { %v775_v36 = vor.u32 1.1754944e-38, %v774_v42  ;;  %vm773_vm4 = vcmp.eq.f32.partialorder %v772_v43, 8.507059e+37 }
 0xbde   :  { %v1271_v37 = vpop.eup %1270 }
 0xbdf   :  { %v764_v33 = vmul.f32 %v1271_v37, %v762_v0  ;;  %vm769_vm1 = vweird.f32 %v1271_v37 }
 0xbe0   :  { %vm770_vm3 = vmor %vm768_vm2, %vm769_vm1 }
 0xbe1   :  { %v765_v39 = vsub.f32 1.0, %v764_v33 }
 0xbe3   :  { %v766_v40 = vmul.f32 %v1271_v37, %v765_v39 }
 0xbe5   :  { %v767_v41 = vadd.f32 %v1271_v37, %v766_v40 }
 0xbe7   :  { %v771_v44 = vsel %vm770_vm3, %v1271_v37, %v767_v41 }
 0xbe8   :  { %v776_v46 = vsel %vm773_vm4, %v775_v36, %v771_v44  ;;  %v896_v36 = vpop.f32.mrf.mxu2 }
 0xbe9   :  { %v779_v48 = vmul.f32 %v776_v46, %v706_v15 }
 0xc46   :  { %v782_v45 = vpop.permute.xlu1 %781 }
 0xc47   :  { %v784_v47 = vmul.f32 %v782_v45, %v776_v46  ;;  %v897_v45 = vadd.f32 %v896_v36, %v1696_v38  ;;  %v1073_v36 = vld [vmem:[#allocation11 + $0x8] sm:$0xff] }
 0xc49   :  { %786 = vrot.lane.b32.xlu2 %v784_v47, %s1518_s0 }
 0xca3   :  { %v787_v49 = vpop.permute.xlu2 %786 }
 0xca4   :  { %v789_v50 = vadd.f32 %v787_v49, %v779_v48  ;;  %v547_v48 = vrot.slane %v1729_v22, 7 }
 0xca6   :  { %1272 = vtanh.f32 %v789_v50 }
 0xcac   :  { %v1273_v51 = vpop.eup %1272 }
 0xcad   :  { %792 = vrot.lane.b32.xlu0 %v1273_v51, %s1517_s2 }
 0xd1f   :  { %v793_v53 = vpop.permute.xlu0 %792 }
 0xd20   :  { %v795_v54 = vmul.f32 %v793_v53, %v776_v46 }
 0xd22   :  { %v1053_v55 = vrot.slane %v795_v54, 6  ;;  %817 = vrot.lane.b32.xlu1 %v795_v54, %s1518_s0 }
 0xd24   :  { %v1752_v57 = vsel %vm1064_vm7, %v1063_v56, %v1053_v55  ;;  %vm1068_vm7 = vcmask 1043456  }
 0xd94   :  { %v818_v58 = vpop.permute.xlu1 %817 }
 0xd95   :  { %1184 = vmatmul.msk.f32.vlgmr.msrb.gmra.mxu1 %vm217_vm5, %v818_v58 }
 0xe12   :  { %v838_v1 = vpop.f32.mrf.mxu1 }
 0xe13   :  { %v841_v2 = vadd.f32 %v838_v1, %v814_v60 }
 0xe15   :  { %1274 = vtanh.f32 %v841_v2  ;;  %v1185_v4 = vmul.f32 -1.442695, %v841_v2 }
 0xe17   :  { %1276 = vpow2.f32 %v1185_v4 }
 0xe1b   :  { %v1275_v3 = vpop.eup %1274 }
 0xe1c   :  { %864 = vrot.lane.b32.xlu2 %v1275_v3, %s1517_s2 }
 0xe1d   :  { %v1277_v5 = vpop.eup %1276 }
 0xe1e   :  { %v845_v6 = vadd.f32 1.0, %v1277_v5 }
 0xe20   :  { %1278 = vrcp.f32 %v845_v6  ;;  %v857_v12 = vand.u32 2147483648, %v845_v6  ;;  %vm851_vm9 = vweird.f32 %v845_v6  ;;  %v855_v13 = vand.u32 2147483647, %v845_v6 }
 0xe21   :  { %1280 = vtanh.f32 %v525_v18 }
 0xe22   :  { %v858_v16 = vor.u32 1.1754944e-38, %v857_v12  ;;  %vm856_vm11 = vcmp.eq.f32.partialorder %v855_v13, 8.507059e+37 }
 0xe26   :  { %v1279_v20 = vpop.eup %1278 }
 0xe27   :  { %v847_v7 = vmul.f32 %v1279_v20, %v845_v6  ;;  %vm852_vm8 = vweird.f32 %v1279_v20  ;;  %v1281_v24 = vpop.eup %1280 }
 0xe28   :  { %vm853_vm10 = vmor %vm851_vm9, %vm852_vm8 }
 0xe29   :  { %v848_v8 = vsub.f32 1.0, %v847_v7 }
 0xe2b   :  { %v849_v9 = vmul.f32 %v1279_v20, %v848_v8 }
 0xe2d   :  { %v850_v10 = vadd.f32 %v1279_v20, %v849_v9 }
 0xe2f   :  { %v854_v15 = vsel %vm853_vm10, %v1279_v20, %v850_v10 }
 0xe30   :  { %v859_v21 = vsel %vm856_vm11, %v858_v16, %v854_v15 }
 0xe31   :  { %v862_v25 = vmul.f32 %v859_v21, %v789_v50 }
 0xe76   :  { %v865_v19 = vpop.permute.xlu2 %864 }
 0xe77   :  { %v867_v23 = vmul.f32 %v865_v19, %v859_v21 }
 0xe79   :  { %869 = vrot.lane.b32.xlu0 %v867_v23, %s1518_s0 }
 0xe81   :  { %551 = vrot.lane.b32.xlu0 %v1281_v24, %s1517_s2 }
 0xeeb   :  { %v870_v26 = vpop.permute.xlu0 %869 }
 0xeec   :  { %v1761_v27 = vadd.f32 %v870_v26, %v862_v25 }
 0xeee   :  { %1282 = vtanh.f32 %v1761_v27 }
 0xeef   :  { %1284 = vpow2.f32 %v1174_v29 }
 0xef3   :  { %v552_v41 = vpop.permute.xlu0 %551 }
 0xef4   :  { %v1283_v28 = vpop.eup %1282 }
 0xef5   :  { %875 = vrot.lane.b32.xlu1 %v1283_v28, %s1517_s2  ;;  %v1285_v11 = vpop.eup %1284 }
 0xef6   :  { %v529_v17 = vadd.f32 1.0, %v1285_v11 }
 0xef8   :  { %1286 = vrcp.f32 %v529_v17  ;;  %v541_v63 = vand.u32 2147483648, %v529_v17  ;;  %vm535_vm14 = vweird.f32 %v529_v17  ;;  %v539_v0 = vand.u32 2147483647, %v529_v17 }
 0xefa   :  { %v542_v40 = vor.u32 1.1754944e-38, %v541_v63  ;;  %vm540_vm1 = vcmp.eq.f32.partialorder %v539_v0, 8.507059e+37 }
 0xefe   :  { %v1287_v30 = vpop.eup %1286 }
 0xeff   :  { %v531_v31 = vmul.f32 %v1287_v30, %v529_v17  ;;  %vm536_vm12 = vweird.f32 %v1287_v30 }
 0xf00   :  { %vm537_vm15 = vmor %vm535_vm14, %vm536_vm12  ;;  %vm1070_vm12 = vcmask 1044480  }
 0xf01   :  { %v532_v32 = vsub.f32 1.0, %v531_v31 }
 0xf03   :  { %v533_v34 = vmul.f32 %v1287_v30, %v532_v32 }
 0xf05   :  { %v534_v61 = vadd.f32 %v1287_v30, %v533_v34 }
 0xf07   :  { %v538_v33 = vsel %vm537_vm15, %v1287_v30, %v534_v61 }
 0xf08   :  { %v543_v42 = vsel %vm540_vm1, %v542_v40, %v538_v33 }
 0xf09   :  { %v554_v43 = vmul.f32 %v552_v41, %v543_v42  ;;  %v549_v50 = vmul.f32 %v547_v48, %v543_v42 }
 0xf67   :  { %v876_v35 = vpop.permute.xlu1 %875 }
 0xf68   :  { %v878_v62 = vmul.f32 %v876_v35, %v859_v21 }
 0xf6a   :  { %v1055_v37 = vrot.slane %v878_v62, 5  ;;  %900 = vrot.lane.b32.xlu2 %v878_v62, %s1518_s0 }
 0xf6c   :  { %v1767_v39 = vsel %vm1066_vm13, %v1752_v57, %v1055_v37 }
 0xf72   :  { %556 = vrot.lane.b32.xlu2 %v554_v43, %s1518_s0  ;;  %v1075_v43 = vld [vmem:[#allocation11 + $0x18] sm:$0xff] }
 0xf73   :  { %1097 = vmatpush.msra.mxu2 %v1075_v43 }
 0xfc4   :  { %v901_v44 = vpop.permute.xlu2 %900 }
 0xfc5   :  { %1187 = vmatmul.msk.f32.vlgmr.msrb.gmra.mxu3 %vm217_vm5, %v901_v44  ;;  %v1074_v44 = vld [vmem:[#allocation11 + $0x10] sm:$0xff] }
 0xfc6   :  { %1098 = vmatpush.msra.mxu2 %v1074_v44 }
 0xfc8   :  { %1099 = vmatpush.msra.mxu2 %v1073_v36 }
 0xfcc   :  { %v557_v49 = vpop.permute.xlu2 %556 }
 0xfcd   :  { %v559_v51 = vadd.f32 %v557_v49, %v549_v50  ;;  %v1113_v50 = vld [vmem:[%s1829_s9 + $0x38] sm:$0xff] }
 0xfce   :  { %1129 = vmatpush.msra.mxu3 %v1113_v50 }
0x1048   :  { %v921_v46 = vpop.f32.mrf.mxu3 }
0x1049   :  { %v924_v47 = vadd.f32 %v921_v46, %v897_v45  ;;  %v1072_v45 = vld [vmem:[#allocation11] sm:$0xff] }
0x104a   :  { %1100 = vmatpush.msra.mxu2 %v1072_v45 }
0x104b   :  { %1288 = vtanh.f32 %v924_v47  ;;  %v1188_v54 = vmul.f32 -1.442695, %v924_v47 }
0x104c   :  { %1290 = vtanh.f32 %v559_v51  ;;  %v1112_v51 = vld [vmem:[%s1829_s9 + $0x30] sm:$0xff] }
0x104d   :  { %1292 = vpow2.f32 %v1188_v54  ;;  %1130 = vmatpush.msra.mxu3 %v1112_v51  ;;  %v1109_v54 = vld [vmem:[%s1829_s9 + $0x18] sm:$0xff] }
0x1051   :  { %v1289_v52 = vpop.eup %1288 }
0x1052   :  { %947 = vrot.lane.b32.xlu1 %v1289_v52, %s1517_s2  ;;  %v1291_v53 = vpop.eup %1290  ;;  %v1111_v52 = vld [vmem:[%s1829_s9 + $0x28] sm:$0xff] }
0x1053   :  { %v1293_v55 = vpop.eup %1292  ;;  %1131 = vmatpush.msra.mxu3 %v1111_v52 }
0x1054   :  { %v928_v56 = vadd.f32 1.0, %v1293_v55 }
0x1056   :  { %1294 = vrcp.f32 %v928_v56  ;;  %v940_v1 = vand.u32 2147483648, %v928_v56  ;;  %vm934_vm3 = vweird.f32 %v928_v56  ;;  %v938_v2 = vand.u32 2147483647, %v928_v56 }
0x1058   :  { %v941_v4 = vor.u32 1.1754944e-38, %v940_v1  ;;  %vm939_vm6 = vcmp.eq.f32.partialorder %v938_v2, 8.507059e+37  ;;  %v1209_v2 = vld [vmem:[%s1830_s10] ss:$0 sm:$0xff] }
0x105a   :  { %562 = vrot.lane.b32.xlu1 %v1291_v53, %s1517_s2  ;;  %v1110_v53 = vld [vmem:[%s1829_s9 + $0x20] sm:$0xff] }
0x105b   :  { %1132 = vmatpush.msra.mxu3 %v1110_v53 }
0x105c   :  { %v1295_v57 = vpop.eup %1294 }
0x105d   :  { %v930_v58 = vmul.f32 %v1295_v57, %v928_v56  ;;  %vm935_vm2 = vweird.f32 %v1295_v57  ;;  %1133 = vmatpush.msra.mxu3 %v1109_v54  ;;  %v1108_v56 = vld [vmem:[%s1829_s9 + $0x10] sm:$0xff] }
0x105e   :  { %vm936_vm4 = vmor %vm934_vm3, %vm935_vm2 }
0x105f   :  { %v931_v59 = vsub.f32 1.0, %v930_v58  ;;  %1134 = vmatpush.msra.mxu3 %v1108_v56  ;;  %v1106_v58 = vld [vmem:[%s1829_s9] sm:$0xff] }
0x1061   :  { %v932_v22 = vmul.f32 %v1295_v57, %v931_v59  ;;  %v1208_v59 = vld [vmem:[#allocation13] ss:$0 sm:$0xff] }
0x1063   :  { %v933_v60 = vadd.f32 %v1295_v57, %v932_v22 }
0x1065   :  { %v937_v3 = vsel %vm936_vm4, %v1295_v57, %v933_v60  ;;  %v1107_v57 = vld [vmem:[%s1829_s9 + $0x8] sm:$0xff] }
0x1066   :  { %v942_v6 = vsel %vm939_vm6, %v941_v4, %v937_v3  ;;  %1135 = vmatpush.msra.mxu3 %v1107_v57 }
0x1067   :  { %v945_v10 = vmul.f32 %v942_v6, %v1761_v27 }
0x1068   :  { %1136 = vmatpush.msra.mxu3 %v1106_v58 }
0x10c4   :  { %v948_v5 = vpop.permute.xlu1 %947 }
0x10c5   :  { %v950_v20 = vmul.f32 %v948_v5, %v942_v6 }
0x10c7   :  { %952 = vrot.lane.b32.xlu0 %v950_v20, %s1518_s0 }
0x10cc   :  { %v563_v7 = vpop.permute.xlu1 %562 }
0x10cd   :  { %v565_v8 = vmul.f32 %v563_v7, %v543_v42 }
0x10cf   :  { %v963_v9 = vrot.slane %v565_v8, 5 }
0x10d1   :  { %964 = vrot.lane.b32.xlu0 %v963_v9, %s1518_s0 }
0x1139   :  { %v953_v12 = vpop.permute.xlu0 %952 }
0x113a   :  { %v955_v13 = vadd.f32 %v953_v12, %v945_v10 }
0x113c   :  { %1296 = vtanh.f32 %v955_v13 }
0x1142   :  { %v1297_v14 = vpop.eup %1296 }
0x1143   :  { %958 = vrot.lane.b32.xlu2 %v1297_v14, %s1517_s2  ;;  %v965_v15 = vpop.permute.xlu0 %964 }
0x1144   :  { %1189 = vmatmul.msk.f32.vlgmr.msrb.gmra.mxu0 %vm217_vm5, %v965_v15 }
0x119d   :  { %v959_v16 = vpop.permute.xlu2 %958 }
0x119e   :  { %v961_v18 = vmul.f32 %v959_v16, %v942_v6 }
0x11a0   :  { %v1057_v19 = vrot.slane %v961_v18, 4  ;;  %989 = vrot.lane.b32.xlu1 %v961_v18, %s1518_s0 }
0x11a2   :  { %v1069_v21 = vsel %vm1068_vm7, %v1767_v39, %v1057_v19 }
0x11c1   :  { %v985_v24 = vpop.f32.mrf.mxu0 }
0x11c2   :  { %v986_v25 = vadd.f32 %v985_v24, %v1696_v38 }
0x1212   :  { %v990_v23 = vpop.permute.xlu1 %989 }
0x1213   :  { %1190 = vmatmul.msk.f32.vlgmr.msra.gmra.mxu1 %vm217_vm5, %v990_v23 }
0x1290   :  { %v1010_v26 = vpop.f32.mrf.mxu1 }
0x1291   :  { %v1013_v27 = vadd.f32 %v1010_v26, %v986_v25 }
0x1293   :  { %1298 = vtanh.f32 %v1013_v27  ;;  %v1191_v29 = vmul.f32 -1.442695, %v1013_v27 }
0x1295   :  { %1300 = vpow2.f32 %v1191_v29 }
0x1299   :  { %v1299_v28 = vpop.eup %1298 }
0x129a   :  { %1036 = vrot.lane.b32.xlu2 %v1299_v28, %s1517_s2 }
0x129b   :  { %v1301_v11 = vpop.eup %1300 }
0x129c   :  { %v1017_v17 = vadd.f32 1.0, %v1301_v11 }
0x129e   :  { %1302 = vrcp.f32 %v1017_v17  ;;  %v1029_v61 = vand.u32 2147483648, %v1017_v17  ;;  %vm1023_vm9 = vweird.f32 %v1017_v17  ;;  %v1027_v38 = vand.u32 2147483647, %v1017_v17 }
0x12a0   :  { %v1030_v63 = vor.u32 1.1754944e-38, %v1029_v61  ;;  %vm1028_vm11 = vcmp.eq.f32.partialorder %v1027_v38, 8.507059e+37 }
0x12a4   :  { %v1303_v30 = vpop.eup %1302 }
0x12a5   :  { %v1019_v31 = vmul.f32 %v1303_v30, %v1017_v17  ;;  %vm1024_vm8 = vweird.f32 %v1303_v30 }
0x12a6   :  { %vm1025_vm10 = vmor %vm1023_vm9, %vm1024_vm8 }
0x12a7   :  { %v1020_v32 = vsub.f32 1.0, %v1019_v31 }
0x12a9   :  { %v1021_v34 = vmul.f32 %v1303_v30, %v1020_v32 }
0x12ab   :  { %v1022_v35 = vadd.f32 %v1303_v30, %v1021_v34 }
0x12ad   :  { %v1026_v62 = vsel %vm1025_vm10, %v1303_v30, %v1022_v35 }
0x12ae   :  { %v1031_v37 = vsel %vm1028_vm11, %v1030_v63, %v1026_v62 }
0x12af   :  { %v1034_v39 = vmul.f32 %v1031_v37, %v955_v13 }
0x12f4   :  { %v1037_v0 = vpop.permute.xlu2 %1036 }
0x12f5   :  { %v1039_v33 = vmul.f32 %v1037_v0, %v1031_v37 }
0x12f7   :  { %1041 = vrot.lane.b32.xlu0 %v1039_v33, %s1518_s0 }
0x1369   :  { %v1042_v40 = vpop.permute.xlu0 %1041 }
0x136a   :  { %v1044_v41 = vadd.f32 %v1042_v40, %v1034_v39 }
0x136c   :  { %1304 = vtanh.f32 %v1044_v41 }
0x1372   :  { %v1305_v42 = vpop.eup %1304 }
0x1373   :  { %1047 = vrot.lane.b32.xlu1 %v1305_v42, %s1517_s2 }
0x13e5   :  { %v1048_v46 = vpop.permute.xlu1 %1047 }
0x13e6   :  { %v1050_v47 = vmul.f32 %v1048_v46, %v1031_v37 }
0x13e8   :  { %v1060_v48 = vrot.slane %v1050_v47, 3 }
0x13ea   :  { %v1071_v49 = vsel %vm1070_vm12, %v1069_v21, %v1060_v48 }
0x13eb   :  { %1081 = vrot.lane.b32.xlu2 %v1071_v49, %s1518_s0 }
0x1445   :  { %v1082_v55 = vpop.permute.xlu2 %1081 }
0x1446   :  { %1192 = vmatmul.msk.f32.vlgmr.msra.gmra.mxu2 %vm217_vm5, %v1082_v55  ;;  %vm1141_vm5 = vcmask 62464  }
0x14c9   :  { %v1102_v22 = vpop.f32.mrf.mxu2 }
0x14ca   :  { %v1103_v60 = vadd.f32 %v1208_v59, %v1102_v22 }
0x14cc   :  { %v1105_v1 = vmax.f32 %v1103_v60, 0.0 }
0x14ce   :  { %1193 = vmatmul.msk.f32.vlgmr.msra.gmra.mxu3 %vm159_vm0, %v1105_v1 }
0x1551   :  { %v1138_v3 = vpop.f32.mrf.mxu3 }
0x1552   :  { %v1139_v4 = vadd.f32 %v1209_v2, %v1138_v3 }
0x1554   :  { %1142 = vst.msk [vmem:[#allocation14] sm:$0x3f] %vm1141_vm5, %v1139_v4 }
0x1555   :  { %1153 = dma.vmem_to_hbm [thread:$0]  %s1149_s19, 128, %s1151_s21, [#allocation4]  }
0x1556   :  { %1506 = dma.done.wait [#allocation4], 128  }
0x1557   :  { %1507 = vsyncadd [#allocation4], 4294967168 }
0x1558   :  { %1158 = vsyncpa [#allocation3], 1 }
0x1559   :  { %1159 = vsyncpa [#allocation6], 1 }
0x155a   :  { %1160 = vsyncpa [#allocation9], 1 }
0x155b   :  { %1161 = vsyncpa [#allocation12], 1 }
0x155c   :  { %1162 = vsyncpa [#allocation4], 1 }

</bundles_post_ra>
